<compile_context>
chip_gen: v7x
topology: tpu7x:2x2x1
jax: 0.10.0
libtpu: 0.0.40
codegen_flags: <defaults>
</compile_context>

<pallas_src>
import functools

import jax
import jax.numpy as jnp
from jax import lax
from jax.experimental import pallas as pl
from jax.experimental.pallas import tpu as pltpu

NUM_HEADS = 8


def _ca_stack_kernel(tgt_ref, mem_ref,
                     wq_ref, wk_ref, wv_ref,
                     bq_ref, bk_ref, bv_ref,
                     wo_ref, bo_ref,
                     gamma_ref, beta_ref,
                     out_ref, x_scratch,
                     *, num_heads, head_dim, batch_block, use_bf16, approx_recip):
    layer = pl.program_id(1)
    n_layers = pl.num_programs(1)
    f32 = jnp.float32
    cdt = jnp.bfloat16 if use_bf16 else jnp.float32

    Bt = batch_block
    H, hd = num_heads, head_dim

    # Load the batch-block target activation into the resident VMEM scratch at
    # the first layer; it is carried (in f32) across the "arbitrary" layer axis.
    @pl.when(layer == 0)
    def _():
        x_scratch[...] = tgt_ref[...].astype(f32)

    x = x_scratch[...]                                   # (Bt, Lt, D) f32
    _, Lt, D = x.shape
    Lm = mem_ref.shape[1]

    xc = x.reshape(Bt * Lt, D).astype(cdt)               # matmul operand dtype
    mc = mem_ref[...].astype(cdt).reshape(Bt * Lm, D)    # already bf16 if use_bf16

    def proj(a, w_ref, b_ref):
        # full-D-width projection on the MXU, f32 accumulation, f32 bias add
        y = jnp.dot(a, w_ref[0], preferred_element_type=f32)
        return y + b_ref[0]

    # 1/sqrt(head_dim) is folded into WQ / bq in the wrapper.
    q = proj(xc, wq_ref, bq_ref)                         # (Bt*Lt, D) f32
    k = proj(mc, wk_ref, bk_ref)                         # (Bt*Lm, D) f32
    v = proj(mc, wv_ref, bv_ref)                         # (Bt*Lm, D) f32

    q3 = q.reshape(Bt, Lt, D).astype(cdt)
    k3 = k.reshape(Bt, Lm, D).astype(cdt)
    v3 = v.reshape(Bt, Lm, D).astype(cdt)

    # contract the last (head_dim) axis of both operands: Q @ K^T per head
    dn_nt = (((1,), (1,)), ((), ()))

    per_batch = []
    for b in range(Bt):                                  # static unroll
        heads = []
        for h in range(H):                               # static unroll, lane slices
            sl = slice(h * hd, (h + 1) * hd)
            qh = q3[b, :, sl]                            # (Lt, hd)
            kh = k3[b, :, sl]                            # (Lm, hd)
            vh = v3[b, :, sl]                            # (Lm, hd)

            s = lax.dot_general(qh, kh, dn_nt, preferred_element_type=f32)  # (Lt, Lm)
            s = s - jnp.max(s, axis=-1, keepdims=True)
            p = jnp.exp(s)
            denom = jnp.sum(p, axis=-1, keepdims=True)
            if approx_recip:
                p = p * pl.reciprocal(denom, approx=True)
            else:
                p = p / denom
            heads.append(jnp.dot(p.astype(cdt), vh,
                                 preferred_element_type=f32))               # (Lt, hd)
        per_batch.append(jnp.concatenate(heads, axis=-1))                   # (Lt, D)
    attn = per_batch[0] if Bt == 1 else jnp.concatenate(per_batch, axis=0)  # (Bt*Lt, D)

    # fused output projection: single (Bt*Lt, D) @ (D, D)
    o = jnp.dot(attn.astype(cdt), wo_ref[0], preferred_element_type=f32) + bo_ref[0]

    y = x + o.reshape(Bt, Lt, D)                         # residual, f32

    # All layers except the last: LayerNorm (eps = 1e-5), carry in scratch.
    @pl.when(layer < n_layers - 1)
    def _():
        mu = jnp.mean(y, axis=-1, keepdims=True)
        var = jnp.mean((y - mu) ** 2, axis=-1, keepdims=True)
        yn = (y - mu) * lax.rsqrt(var + 1e-5)
        x_scratch[...] = yn * gamma_ref[0] + beta_ref[0]

    # Last layer: write the result (output block is resident across layers and
    # written back to HBM once per batch block).
    @pl.when(layer == n_layers - 1)
    def _():
        out_ref[...] = y.astype(out_ref.dtype)


def ca_forward(tgt, memory, layer_params, *, num_heads=NUM_HEADS, use_bf16=True,
               approx_recip=True, batch_block=None,
               vmem_limit_bytes=48 * 1024 * 1024):
    """Equivalent of CA.forward: fused stack of cross-attention blocks.

    layer_params: list of (wq, wk, wv, bq, bk, bv, wo, bo, gamma, beta) with
    PyTorch Linear convention (W: (out, in), y = x @ W^T + b).

    use_bf16:     bf16 matmul operands (weights / memory pre-cast, f32 accumulation).
    approx_recip: EUP approximate reciprocal in the softmax normalization.
    batch_block:  batch elements per grid step (amortizes weight DMA). Auto-picked
                  so the batch grid axis keeps extent >= 2 (megacore) when possible.
    vmem_limit_bytes: scoped VMEM limit; raise toward ~100 MiB on v5e/v6e for large
                  shapes, keep <= ~48-56 MiB budget on v7x.
    """
    B, Lt, D = tgt.shape
    Bm, Lm, Dm = memory.shape
    assert Bm == B and Dm == D
    L = len(layer_params)
    assert D % num_heads == 0
    hd = D // num_heads
    scale = 1.0 / (hd ** 0.5)
    wdt = jnp.bfloat16 if use_bf16 else jnp.float32

    if batch_block is None:
        batch_block = 1
        for c in range(1, B + 1):
            if B % c == 0 and (B // c) >= 2 and c <= 8:
                batch_block = c
    assert B % batch_block == 0
    Bt = batch_block

    # ---- one-time parameter preprocessing (outside the kernel) -------------
    wq_l, wk_l, wv_l, wo_l = [], [], [], []
    bq_l, bk_l, bv_l, bo_l, g_l, bt_l = [], [], [], [], [], []
    for (wq, wk, wv, bq, bk, bv, wo, bo, gamma, beta) in layer_params:
        wq_l.append(jnp.asarray(wq).T * scale)           # pre-transpose + fold scale
        wk_l.append(jnp.asarray(wk).T)
        wv_l.append(jnp.asarray(wv).T)
        wo_l.append(jnp.asarray(wo).T)
        bq_l.append(jnp.asarray(bq).reshape(1, D) * scale)
        bk_l.append(jnp.asarray(bk).reshape(1, D))
        bv_l.append(jnp.asarray(bv).reshape(1, D))
        bo_l.append(jnp.asarray(bo).reshape(1, D))
        g_l.append(jnp.asarray(gamma).reshape(1, D))     # last-layer entries unused
        bt_l.append(jnp.asarray(beta).reshape(1, D))
    WQ = jnp.stack(wq_l).astype(wdt)                      # (L, D, D)
    WK = jnp.stack(wk_l).astype(wdt)
    WV = jnp.stack(wv_l).astype(wdt)
    WO = jnp.stack(wo_l).astype(wdt)
    BQ, BK, BV = jnp.stack(bq_l), jnp.stack(bk_l), jnp.stack(bv_l)   # (L, 1, D) f32
    BO, G, BT = jnp.stack(bo_l), jnp.stack(g_l), jnp.stack(bt_l)     # (L, 1, D) f32

    mem_in = memory.astype(wdt) if use_bf16 else memory   # halve memory DMA bytes

    kernel = functools.partial(_ca_stack_kernel, num_heads=num_heads, head_dim=hd,
                               batch_block=Bt, use_bf16=use_bf16,
                               approx_recip=approx_recip)

    def act_spec(Ln):
        return pl.BlockSpec((Bt, Ln, D), lambda b, l: (b, 0, 0))

    def w_spec(shape):
        n = len(shape)
        return pl.BlockSpec((1,) + shape, lambda b, l, _n=n: (l,) + (0,) * _n)

    w_item = 2 if use_bf16 else 4
    flops = 4 * B * L * (Lt * D * D + Lm * D * D + Lt * Lm * D)
    cost = pl.CostEstimate(
        flops=int(flops),
        transcendentals=int(B * L * num_heads * Lt * Lm),
        bytes_accessed=int(8 * B * Lt * D + w_item * B * Lm * D
                           + (B // Bt) * L * (4 * D * D * w_item + 6 * D * 4)))

    # grid: batch blocks ("parallel", megacore) x layers ("arbitrary", carried state)
    return pl.pallas_call(
        kernel,
        out_shape=jax.ShapeDtypeStruct((B, Lt, D), tgt.dtype),
        grid_spec=pltpu.PrefetchScalarGridSpec(
            num_scalar_prefetch=0,
            grid=(B // Bt, L),
            in_specs=[
                act_spec(Lt),            # tgt
                act_spec(Lm),            # memory (bf16 if use_bf16)
                w_spec((D, D)),          # WQ (pre-scaled)
                w_spec((D, D)),          # WK
                w_spec((D, D)),          # WV
                w_spec((1, D)),          # bq (pre-scaled)
                w_spec((1, D)),          # bk
                w_spec((1, D)),          # bv
                w_spec((D, D)),          # WO
                w_spec((1, D)),          # bo
                w_spec((1, D)),          # gamma
                w_spec((1, D)),          # beta
            ],
            out_specs=pl.BlockSpec((Bt, Lt, D), lambda b, l: (b, 0, 0)),
            scratch_shapes=[pltpu.VMEM((Bt, Lt, D), jnp.float32)],
        ),
        compiler_params=pltpu.CompilerParams(
            dimension_semantics=("parallel", "arbitrary"),
            vmem_limit_bytes=vmem_limit_bytes),
        cost_estimate=cost,
    )(tgt, mem_in, WQ, WK, WV, BQ, BK, BV, WO, BO, G, BT)


def init_ca_params(key, input_dim, num):
    """Deterministic synthetic parameters mirroring CA.__init__ shapes."""
    params = []
    for _ in range(num):
        key, *ks = jax.random.split(key, 11)
        wq = jax.random.normal(ks[0], (input_dim, input_dim), jnp.float32) * 0.05
        wk = jax.random.normal(ks[1], (input_dim, input_dim), jnp.float32) * 0.05
        wv = jax.random.normal(ks[2], (input_dim, input_dim), jnp.float32) * 0.05
        bq = jax.random.normal(ks[3], (1, input_dim), jnp.float32) * 0.01
        bk = jax.random.normal(ks[4], (1, input_dim), jnp.float32) * 0.01
        bv = jax.random.normal(ks[5], (1, input_dim), jnp.float32) * 0.01
        wo = jax.random.normal(ks[6], (input_dim, input_dim), jnp.float32) * 0.05
        bo = jax.random.normal(ks[7], (1, input_dim), jnp.float32) * 0.01
        gamma = 1.0 + 0.1 * jax.random.normal(ks[8], (1, input_dim), jnp.float32)
        beta = 0.01 * jax.random.normal(ks[9], (1, input_dim), jnp.float32)
        params.append((wq, wk, wv, bq, bk, bv, wo, bo, gamma, beta))
    return params


def ca_reference(tgt, memory, layer_params, num_heads=NUM_HEADS):
    """Pure-JAX reference matching nn.MultiheadAttention / nn.LayerNorm."""
    B, Lt, D = tgt.shape
    Lm = memory.shape[1]
    hd = D // num_heads
    scale = 1.0 / (hd ** 0.5)
    x = tgt
    L = len(layer_params)
    for i, (wq, wk, wv, bq, bk, bv, wo, bo, gamma, beta) in enumerate(layer_params):
        q = jnp.einsum('bld,ed->ble', x, wq) + bq.reshape(D)
        k = jnp.einsum('bld,ed->ble', memory, wk) + bk.reshape(D)
        v = jnp.einsum('bld,ed->ble', memory, wv) + bv.reshape(D)
        qh = q.reshape(B, Lt, num_heads, hd).transpose(0, 2, 1, 3)
        kh = k.reshape(B, Lm, num_heads, hd).transpose(0, 2, 1, 3)
        vh = v.reshape(B, Lm, num_heads, hd).transpose(0, 2, 1, 3)
        s = jnp.einsum('bhqe,bhke->bhqk', qh, kh) * scale
        p = jax.nn.softmax(s, axis=-1)
        a = jnp.einsum('bhqk,bhke->bhqe', p, vh).transpose(0, 2, 1, 3).reshape(B, Lt, D)
        o = jnp.einsum('ble,de->bld', a, wo) + bo.reshape(D)
        x = x + o
        if i != L - 1:
            mu = x.mean(-1, keepdims=True)
            var = ((x - mu) ** 2).mean(-1, keepdims=True)
            x = (x - mu) / jnp.sqrt(var + 1e-5) * gamma.reshape(D) + beta.reshape(D)
    return x


if __name__ == "__main__":
    B, Lt, Lm, D, NUM_LAYERS = 2, 8, 16, 32, 3    # D=32 -> 8 heads of dim 4

    key = jax.random.PRNGKey(0)
    k_tgt, k_mem, k_par = jax.random.split(key, 3)
    tgt = jax.random.normal(k_tgt, (B, Lt, D), jnp.float32)
    memory = jax.random.normal(k_mem, (B, Lm, D), jnp.float32)
    layer_params = init_ca_params(k_par, D, NUM_LAYERS)

    ref = jax.block_until_ready(ca_reference(tgt, memory, layer_params))

    # exact-math validation path (f32 operands, exact softmax reciprocal)
    out_f32 = jax.block_until_ready(
        ca_forward(tgt, memory, layer_params, use_bf16=False, approx_recip=False))
    assert out_f32.shape == (B, Lt, D)
    err32 = float(jnp.max(jnp.abs(out_f32 - ref)))
    assert err32 < 1e-3, f"f32 max abs error {err32}"

    # default fast path (bf16 matmul operands, approx softmax reciprocal)
    out_fast = jax.block_until_ready(ca_forward(tgt, memory, layer_params))
    errbf = float(jnp.max(jnp.abs(out_fast - ref)))
    assert errbf < 1e-1, f"bf16 max abs error {errbf}"

    print("KERNEL_OK")
</pallas_src>

<mosaic_0001>
module attributes {stable_mosaic.version = 11 : i64} {
  func.func @_ca_stack_kernel(%arg0: i32, %arg1: i32, %arg2: memref<1x8x32xf32, #tpu.memory_space<vmem>>, %arg3: memref<1x16x32xf32, #tpu.memory_space<vmem>>, %arg4: memref<1x32x32xf32, #tpu.memory_space<vmem>>, %arg5: memref<1x32x32xf32, #tpu.memory_space<vmem>>, %arg6: memref<1x32x32xf32, #tpu.memory_space<vmem>>, %arg7: memref<1x1x32xf32, #tpu.memory_space<vmem>>, %arg8: memref<1x1x32xf32, #tpu.memory_space<vmem>>, %arg9: memref<1x1x32xf32, #tpu.memory_space<vmem>>, %arg10: memref<1x32x32xf32, #tpu.memory_space<vmem>>, %arg11: memref<1x1x32xf32, #tpu.memory_space<vmem>>, %arg12: memref<1x1x32xf32, #tpu.memory_space<vmem>>, %arg13: memref<1x1x32xf32, #tpu.memory_space<vmem>>, %arg14: memref<1x8x32xf32, #tpu.memory_space<vmem>>, %arg15: memref<1x8x32xf32, #tpu.memory_space<vmem>>) attributes {dimension_semantics = [#tpu.dimension_semantics<parallel>, #tpu.dimension_semantics<arbitrary>], iteration_bounds = array<i64: 2, 3>, scalar_prefetch = 0 : i64, scratch_operands = 1 : i64, tpu.core_type = #tpu.core_type<tc>, window_params = [{transform_indices = @transform_0, window_bounds = array<i64: 1, 8, 32>}, {transform_indices = @transform_1, window_bounds = array<i64: 1, 16, 32>}, {transform_indices = @transform_2, window_bounds = array<i64: 1, 32, 32>}, {transform_indices = @transform_3, window_bounds = array<i64: 1, 32, 32>}, {transform_indices = @transform_4, window_bounds = array<i64: 1, 32, 32>}, {transform_indices = @transform_5, window_bounds = array<i64: 1, 1, 32>}, {transform_indices = @transform_6, window_bounds = array<i64: 1, 1, 32>}, {transform_indices = @transform_7, window_bounds = array<i64: 1, 1, 32>}, {transform_indices = @transform_8, window_bounds = array<i64: 1, 32, 32>}, {transform_indices = @transform_9, window_bounds = array<i64: 1, 1, 32>}, {transform_indices = @transform_10, window_bounds = array<i64: 1, 1, 32>}, {transform_indices = @transform_11, window_bounds = array<i64: 1, 1, 32>}, {transform_indices = @transform_12, window_bounds = array<i64: 1, 8, 32>}]} {
    %c0_i32 = arith.constant 0 : i32
    %0 = arith.cmpi eq, %arg1, %c0_i32 : i32
    %1 = arith.extui %0 : i1 to i32
    %c0_i32_0 = arith.constant 0 : i32
    %2 = arith.cmpi ne, %1, %c0_i32_0 : i32
    scf.if %2 {
      %c0_68 = arith.constant 0 : index
      %c0_69 = arith.constant 0 : index
      %c0_70 = arith.constant 0 : index
      %183 = vector.load %arg2[%c0_68, %c0_69, %c0_70] : memref<1x8x32xf32, #tpu.memory_space<vmem>>, vector<1x8x32xf32>
      %c0_71 = arith.constant 0 : index
      %c0_72 = arith.constant 0 : index
      %c0_73 = arith.constant 0 : index
      %184 = vector.load %arg15[%c0_71, %c0_72, %c0_73] : memref<1x8x32xf32, #tpu.memory_space<vmem>>, vector<1x8x32xf32>
      tpu.vector_store %arg15[%c0_71, %c0_72, %c0_73], %183 {strides = array<i32>} : memref<1x8x32xf32, #tpu.memory_space<vmem>>, vector<1x8x32xf32>,
    } else {
    }
    %c0 = arith.constant 0 : index
    %c0_1 = arith.constant 0 : index
    %c0_2 = arith.constant 0 : index
    %3 = vector.load %arg15[%c0, %c0_1, %c0_2] : memref<1x8x32xf32, #tpu.memory_space<vmem>>, vector<1x8x32xf32>
    %4 = vector.shape_cast %3 : vector<1x8x32xf32> to vector<8x32xf32>
    %c0_3 = arith.constant 0 : index
    %c0_4 = arith.constant 0 : index
    %c0_5 = arith.constant 0 : index
    %5 = vector.load %arg3[%c0_3, %c0_4, %c0_5] : memref<1x16x32xf32, #tpu.memory_space<vmem>>, vector<1x16x32xf32>
    %6 = vector.shape_cast %5 : vector<1x16x32xf32> to vector<16x32xf32>
    %c0_6 = arith.constant 0 : index
    %c0_7 = arith.constant 0 : index
    %c0_8 = arith.constant 0 : index
    %7 = vector.load %arg4[%c0_6, %c0_7, %c0_8] : memref<1x32x32xf32, #tpu.memory_space<vmem>>, vector<1x32x32xf32>
    %8 = vector.shape_cast %7 : vector<1x32x32xf32> to vector<32x32xf32>
    %cst = arith.constant dense<0.000000e+00> : vector<8x32xf32>
    %9 = tpu.matmul %4, %8, %cst {dimension_numbers = #tpu.dot_dimension_numbers<[1], [0], [0], [1], [0, 0, 1, 1], [], []>} : vector<8x32xf32>, vector<32x32xf32>, vector<8x32xf32> -> vector<8x32xf32>
    %c0_9 = arith.constant 0 : index
    %c0_10 = arith.constant 0 : index
    %c0_11 = arith.constant 0 : index
    %10 = vector.load %arg7[%c0_9, %c0_10, %c0_11] : memref<1x1x32xf32, #tpu.memory_space<vmem>>, vector<1x1x32xf32>
    %11 = vector.shape_cast %10 : vector<1x1x32xf32> to vector<1x32xf32>
    %12 = vector.broadcast %11 : vector<1x32xf32> to vector<8x32xf32>
    %13 = arith.addf %9, %12 : vector<8x32xf32>
    %c0_12 = arith.constant 0 : index
    %c0_13 = arith.constant 0 : index
    %c0_14 = arith.constant 0 : index
    %14 = vector.load %arg5[%c0_12, %c0_13, %c0_14] : memref<1x32x32xf32, #tpu.memory_space<vmem>>, vector<1x32x32xf32>
    %15 = vector.shape_cast %14 : vector<1x32x32xf32> to vector<32x32xf32>
    %cst_15 = arith.constant dense<0.000000e+00> : vector<16x32xf32>
    %16 = tpu.matmul %6, %15, %cst_15 {dimension_numbers = #tpu.dot_dimension_numbers<[1], [0], [0], [1], [0, 0, 1, 1], [], []>} : vector<16x32xf32>, vector<32x32xf32>, vector<16x32xf32> -> vector<16x32xf32>
    %c0_16 = arith.constant 0 : index
    %c0_17 = arith.constant 0 : index
    %c0_18 = arith.constant 0 : index
    %17 = vector.load %arg8[%c0_16, %c0_17, %c0_18] : memref<1x1x32xf32, #tpu.memory_space<vmem>>, vector<1x1x32xf32>
    %18 = vector.shape_cast %17 : vector<1x1x32xf32> to vector<1x32xf32>
    %19 = vector.broadcast %18 : vector<1x32xf32> to vector<16x32xf32>
    %20 = arith.addf %16, %19 : vector<16x32xf32>
    %c0_19 = arith.constant 0 : index
    %c0_20 = arith.constant 0 : index
    %c0_21 = arith.constant 0 : index
    %21 = vector.load %arg6[%c0_19, %c0_20, %c0_21] : memref<1x32x32xf32, #tpu.memory_space<vmem>>, vector<1x32x32xf32>
    %22 = vector.shape_cast %21 : vector<1x32x32xf32> to vector<32x32xf32>
    %cst_22 = arith.constant dense<0.000000e+00> : vector<16x32xf32>
    %23 = tpu.matmul %6, %22, %cst_22 {dimension_numbers = #tpu.dot_dimension_numbers<[1], [0], [0], [1], [0, 0, 1, 1], [], []>} : vector<16x32xf32>, vector<32x32xf32>, vector<16x32xf32> -> vector<16x32xf32>
    %c0_23 = arith.constant 0 : index
    %c0_24 = arith.constant 0 : index
    %c0_25 = arith.constant 0 : index
    %24 = vector.load %arg9[%c0_23, %c0_24, %c0_25] : memref<1x1x32xf32, #tpu.memory_space<vmem>>, vector<1x1x32xf32>
    %25 = vector.shape_cast %24 : vector<1x1x32xf32> to vector<1x32xf32>
    %26 = vector.broadcast %25 : vector<1x32xf32> to vector<16x32xf32>
    %27 = arith.addf %23, %26 : vector<16x32xf32>
    %28 = vector.shape_cast %13 : vector<8x32xf32> to vector<1x8x32xf32>
    %29 = vector.shape_cast %20 : vector<16x32xf32> to vector<1x16x32xf32>
    %30 = vector.shape_cast %27 : vector<16x32xf32> to vector<1x16x32xf32>
    %31 = vector.extract_strided_slice %28 {offsets = [0, 0, 0], sizes = [1, 8, 4], strides = [1, 1, 1]} : vector<1x8x32xf32> to vector<1x8x4xf32>
    %32 = vector.shape_cast %31 : vector<1x8x4xf32> to vector<8x4xf32>
    %33 = vector.extract_strided_slice %29 {offsets = [0, 0, 0], sizes = [1, 16, 4], strides = [1, 1, 1]} : vector<1x16x32xf32> to vector<1x16x4xf32>
    %34 = vector.shape_cast %33 : vector<1x16x4xf32> to vector<16x4xf32>
    %35 = vector.extract_strided_slice %30 {offsets = [0, 0, 0], sizes = [1, 16, 4], strides = [1, 1, 1]} : vector<1x16x32xf32> to vector<1x16x4xf32>
    %36 = vector.shape_cast %35 : vector<1x16x4xf32> to vector<16x4xf32>
    %cst_26 = arith.constant dense<0.000000e+00> : vector<8x16xf32>
    %37 = tpu.matmul %32, %34, %cst_26 {dimension_numbers = #tpu.dot_dimension_numbers<[1], [1], [0], [0], [0, 0, 1, 0], [], []>} : vector<8x4xf32>, vector<16x4xf32>, vector<8x16xf32> -> vector<8x16xf32>
    %cst_27 = arith.constant dense<0xFF800000> : vector<8xf32>
    %38 = vector.multi_reduction <maximumf>, %37, %cst_27 [1] : vector<8x16xf32> to vector<8xf32>
    %39 = vector.shape_cast %38 : vector<8xf32> to vector<8x1xf32>
    %40 = vector.broadcast %39 : vector<8x1xf32> to vector<8x16xf32>
    %41 = arith.subf %37, %40 : vector<8x16xf32>
    %42 = math.exp %41 : vector<8x16xf32>
    %cst_28 = arith.constant dense<0.000000e+00> : vector<8xf32>
    %43 = vector.multi_reduction <add>, %42, %cst_28 [1] : vector<8x16xf32> to vector<8xf32>
    %44 = vector.shape_cast %43 : vector<8xf32> to vector<8x1xf32>
    %45 = vector.broadcast %44 : vector<8x1xf32> to vector<8x16xf32>
    %46 = arith.divf %42, %45 : vector<8x16xf32>
    %cst_29 = arith.constant dense<0.000000e+00> : vector<8x4xf32>
    %47 = tpu.matmul %46, %36, %cst_29 {dimension_numbers = #tpu.dot_dimension_numbers<[1], [0], [0], [1], [0, 0, 1, 1], [], []>} : vector<8x16xf32>, vector<16x4xf32>, vector<8x4xf32> -> vector<8x4xf32>
    %48 = vector.extract_strided_slice %28 {offsets = [0, 0, 4], sizes = [1, 8, 4], strides = [1, 1, 1]} : vector<1x8x32xf32> to vector<1x8x4xf32>
    %49 = vector.shape_cast %48 : vector<1x8x4xf32> to vector<8x4xf32>
    %50 = vector.extract_strided_slice %29 {offsets = [0, 0, 4], sizes = [1, 16, 4], strides = [1, 1, 1]} : vector<1x16x32xf32> to vector<1x16x4xf32>
    %51 = vector.shape_cast %50 : vector<1x16x4xf32> to vector<16x4xf32>
    %52 = vector.extract_strided_slice %30 {offsets = [0, 0, 4], sizes = [1, 16, 4], strides = [1, 1, 1]} : vector<1x16x32xf32> to vector<1x16x4xf32>
    %53 = vector.shape_cast %52 : vector<1x16x4xf32> to vector<16x4xf32>
    %cst_30 = arith.constant dense<0.000000e+00> : vector<8x16xf32>
    %54 = tpu.matmul %49, %51, %cst_30 {dimension_numbers = #tpu.dot_dimension_numbers<[1], [1], [0], [0], [0, 0, 1, 0], [], []>} : vector<8x4xf32>, vector<16x4xf32>, vector<8x16xf32> -> vector<8x16xf32>
    %cst_31 = arith.constant dense<0xFF800000> : vector<8xf32>
    %55 = vector.multi_reduction <maximumf>, %54, %cst_31 [1] : vector<8x16xf32> to vector<8xf32>
    %56 = vector.shape_cast %55 : vector<8xf32> to vector<8x1xf32>
    %57 = vector.broadcast %56 : vector<8x1xf32> to vector<8x16xf32>
    %58 = arith.subf %54, %57 : vector<8x16xf32>
    %59 = math.exp %58 : vector<8x16xf32>
    %cst_32 = arith.constant dense<0.000000e+00> : vector<8xf32>
    %60 = vector.multi_reduction <add>, %59, %cst_32 [1] : vector<8x16xf32> to vector<8xf32>
    %61 = vector.shape_cast %60 : vector<8xf32> to vector<8x1xf32>
    %62 = vector.broadcast %61 : vector<8x1xf32> to vector<8x16xf32>
    %63 = arith.divf %59, %62 : vector<8x16xf32>
    %cst_33 = arith.constant dense<0.000000e+00> : vector<8x4xf32>
    %64 = tpu.matmul %63, %53, %cst_33 {dimension_numbers = #tpu.dot_dimension_numbers<[1], [0], [0], [1], [0, 0, 1, 1], [], []>} : vector<8x16xf32>, vector<16x4xf32>, vector<8x4xf32> -> vector<8x4xf32>
    %65 = vector.extract_strided_slice %28 {offsets = [0, 0, 8], sizes = [1, 8, 4], strides = [1, 1, 1]} : vector<1x8x32xf32> to vector<1x8x4xf32>
    %66 = vector.shape_cast %65 : vector<1x8x4xf32> to vector<8x4xf32>
    %67 = vector.extract_strided_slice %29 {offsets = [0, 0, 8], sizes = [1, 16, 4], strides = [1, 1, 1]} : vector<1x16x32xf32> to vector<1x16x4xf32>
    %68 = vector.shape_cast %67 : vector<1x16x4xf32> to vector<16x4xf32>
    %69 = vector.extract_strided_slice %30 {offsets = [0, 0, 8], sizes = [1, 16, 4], strides = [1, 1, 1]} : vector<1x16x32xf32> to vector<1x16x4xf32>
    %70 = vector.shape_cast %69 : vector<1x16x4xf32> to vector<16x4xf32>
    %cst_34 = arith.constant dense<0.000000e+00> : vector<8x16xf32>
    %71 = tpu.matmul %66, %68, %cst_34 {dimension_numbers = #tpu.dot_dimension_numbers<[1], [1], [0], [0], [0, 0, 1, 0], [], []>} : vector<8x4xf32>, vector<16x4xf32>, vector<8x16xf32> -> vector<8x16xf32>
    %cst_35 = arith.constant dense<0xFF800000> : vector<8xf32>
    %72 = vector.multi_reduction <maximumf>, %71, %cst_35 [1] : vector<8x16xf32> to vector<8xf32>
    %73 = vector.shape_cast %72 : vector<8xf32> to vector<8x1xf32>
    %74 = vector.broadcast %73 : vector<8x1xf32> to vector<8x16xf32>
    %75 = arith.subf %71, %74 : vector<8x16xf32>
    %76 = math.exp %75 : vector<8x16xf32>
    %cst_36 = arith.constant dense<0.000000e+00> : vector<8xf32>
    %77 = vector.multi_reduction <add>, %76, %cst_36 [1] : vector<8x16xf32> to vector<8xf32>
    %78 = vector.shape_cast %77 : vector<8xf32> to vector<8x1xf32>
    %79 = vector.broadcast %78 : vector<8x1xf32> to vector<8x16xf32>
    %80 = arith.divf %76, %79 : vector<8x16xf32>
    %cst_37 = arith.constant dense<0.000000e+00> : vector<8x4xf32>
    %81 = tpu.matmul %80, %70, %cst_37 {dimension_numbers = #tpu.dot_dimension_numbers<[1], [0], [0], [1], [0, 0, 1, 1], [], []>} : vector<8x16xf32>, vector<16x4xf32>, vector<8x4xf32> -> vector<8x4xf32>
    %82 = vector.extract_strided_slice %28 {offsets = [0, 0, 12], sizes = [1, 8, 4], strides = [1, 1, 1]} : vector<1x8x32xf32> to vector<1x8x4xf32>
    %83 = vector.shape_cast %82 : vector<1x8x4xf32> to vector<8x4xf32>
    %84 = vector.extract_strided_slice %29 {offsets = [0, 0, 12], sizes = [1, 16, 4], strides = [1, 1, 1]} : vector<1x16x32xf32> to vector<1x16x4xf32>
    %85 = vector.shape_cast %84 : vector<1x16x4xf32> to vector<16x4xf32>
    %86 = vector.extract_strided_slice %30 {offsets = [0, 0, 12], sizes = [1, 16, 4], strides = [1, 1, 1]} : vector<1x16x32xf32> to vector<1x16x4xf32>
    %87 = vector.shape_cast %86 : vector<1x16x4xf32> to vector<16x4xf32>
    %cst_38 = arith.constant dense<0.000000e+00> : vector<8x16xf32>
    %88 = tpu.matmul %83, %85, %cst_38 {dimension_numbers = #tpu.dot_dimension_numbers<[1], [1], [0], [0], [0, 0, 1, 0], [], []>} : vector<8x4xf32>, vector<16x4xf32>, vector<8x16xf32> -> vector<8x16xf32>
    %cst_39 = arith.constant dense<0xFF800000> : vector<8xf32>
    %89 = vector.multi_reduction <maximumf>, %88, %cst_39 [1] : vector<8x16xf32> to vector<8xf32>
    %90 = vector.shape_cast %89 : vector<8xf32> to vector<8x1xf32>
    %91 = vector.broadcast %90 : vector<8x1xf32> to vector<8x16xf32>
    %92 = arith.subf %88, %91 : vector<8x16xf32>
    %93 = math.exp %92 : vector<8x16xf32>
    %cst_40 = arith.constant dense<0.000000e+00> : vector<8xf32>
    %94 = vector.multi_reduction <add>, %93, %cst_40 [1] : vector<8x16xf32> to vector<8xf32>
    %95 = vector.shape_cast %94 : vector<8xf32> to vector<8x1xf32>
    %96 = vector.broadcast %95 : vector<8x1xf32> to vector<8x16xf32>
    %97 = arith.divf %93, %96 : vector<8x16xf32>
    %cst_41 = arith.constant dense<0.000000e+00> : vector<8x4xf32>
    %98 = tpu.matmul %97, %87, %cst_41 {dimension_numbers = #tpu.dot_dimension_numbers<[1], [0], [0], [1], [0, 0, 1, 1], [], []>} : vector<8x16xf32>, vector<16x4xf32>, vector<8x4xf32> -> vector<8x4xf32>
    %99 = vector.extract_strided_slice %28 {offsets = [0, 0, 16], sizes = [1, 8, 4], strides = [1, 1, 1]} : vector<1x8x32xf32> to vector<1x8x4xf32>
    %100 = vector.shape_cast %99 : vector<1x8x4xf32> to vector<8x4xf32>
    %101 = vector.extract_strided_slice %29 {offsets = [0, 0, 16], sizes = [1, 16, 4], strides = [1, 1, 1]} : vector<1x16x32xf32> to vector<1x16x4xf32>
    %102 = vector.shape_cast %101 : vector<1x16x4xf32> to vector<16x4xf32>
    %103 = vector.extract_strided_slice %30 {offsets = [0, 0, 16], sizes = [1, 16, 4], strides = [1, 1, 1]} : vector<1x16x32xf32> to vector<1x16x4xf32>
    %104 = vector.shape_cast %103 : vector<1x16x4xf32> to vector<16x4xf32>
    %cst_42 = arith.constant dense<0.000000e+00> : vector<8x16xf32>
    %105 = tpu.matmul %100, %102, %cst_42 {dimension_numbers = #tpu.dot_dimension_numbers<[1], [1], [0], [0], [0, 0, 1, 0], [], []>} : vector<8x4xf32>, vector<16x4xf32>, vector<8x16xf32> -> vector<8x16xf32>
    %cst_43 = arith.constant dense<0xFF800000> : vector<8xf32>
    %106 = vector.multi_reduction <maximumf>, %105, %cst_43 [1] : vector<8x16xf32> to vector<8xf32>
    %107 = vector.shape_cast %106 : vector<8xf32> to vector<8x1xf32>
    %108 = vector.broadcast %107 : vector<8x1xf32> to vector<8x16xf32>
    %109 = arith.subf %105, %108 : vector<8x16xf32>
    %110 = math.exp %109 : vector<8x16xf32>
    %cst_44 = arith.constant dense<0.000000e+00> : vector<8xf32>
    %111 = vector.multi_reduction <add>, %110, %cst_44 [1] : vector<8x16xf32> to vector<8xf32>
    %112 = vector.shape_cast %111 : vector<8xf32> to vector<8x1xf32>
    %113 = vector.broadcast %112 : vector<8x1xf32> to vector<8x16xf32>
    %114 = arith.divf %110, %113 : vector<8x16xf32>
    %cst_45 = arith.constant dense<0.000000e+00> : vector<8x4xf32>
    %115 = tpu.matmul %114, %104, %cst_45 {dimension_numbers = #tpu.dot_dimension_numbers<[1], [0], [0], [1], [0, 0, 1, 1], [], []>} : vector<8x16xf32>, vector<16x4xf32>, vector<8x4xf32> -> vector<8x4xf32>
    %116 = vector.extract_strided_slice %28 {offsets = [0, 0, 20], sizes = [1, 8, 4], strides = [1, 1, 1]} : vector<1x8x32xf32> to vector<1x8x4xf32>
    %117 = vector.shape_cast %116 : vector<1x8x4xf32> to vector<8x4xf32>
    %118 = vector.extract_strided_slice %29 {offsets = [0, 0, 20], sizes = [1, 16, 4], strides = [1, 1, 1]} : vector<1x16x32xf32> to vector<1x16x4xf32>
    %119 = vector.shape_cast %118 : vector<1x16x4xf32> to vector<16x4xf32>
    %120 = vector.extract_strided_slice %30 {offsets = [0, 0, 20], sizes = [1, 16, 4], strides = [1, 1, 1]} : vector<1x16x32xf32> to vector<1x16x4xf32>
    %121 = vector.shape_cast %120 : vector<1x16x4xf32> to vector<16x4xf32>
    %cst_46 = arith.constant dense<0.000000e+00> : vector<8x16xf32>
    %122 = tpu.matmul %117, %119, %cst_46 {dimension_numbers = #tpu.dot_dimension_numbers<[1], [1], [0], [0], [0, 0, 1, 0], [], []>} : vector<8x4xf32>, vector<16x4xf32>, vector<8x16xf32> -> vector<8x16xf32>
    %cst_47 = arith.constant dense<0xFF800000> : vector<8xf32>
    %123 = vector.multi_reduction <maximumf>, %122, %cst_47 [1] : vector<8x16xf32> to vector<8xf32>
    %124 = vector.shape_cast %123 : vector<8xf32> to vector<8x1xf32>
    %125 = vector.broadcast %124 : vector<8x1xf32> to vector<8x16xf32>
    %126 = arith.subf %122, %125 : vector<8x16xf32>
    %127 = math.exp %126 : vector<8x16xf32>
    %cst_48 = arith.constant dense<0.000000e+00> : vector<8xf32>
    %128 = vector.multi_reduction <add>, %127, %cst_48 [1] : vector<8x16xf32> to vector<8xf32>
    %129 = vector.shape_cast %128 : vector<8xf32> to vector<8x1xf32>
    %130 = vector.broadcast %129 : vector<8x1xf32> to vector<8x16xf32>
    %131 = arith.divf %127, %130 : vector<8x16xf32>
    %cst_49 = arith.constant dense<0.000000e+00> : vector<8x4xf32>
    %132 = tpu.matmul %131, %121, %cst_49 {dimension_numbers = #tpu.dot_dimension_numbers<[1], [0], [0], [1], [0, 0, 1, 1], [], []>} : vector<8x16xf32>, vector<16x4xf32>, vector<8x4xf32> -> vector<8x4xf32>
    %133 = vector.extract_strided_slice %28 {offsets = [0, 0, 24], sizes = [1, 8, 4], strides = [1, 1, 1]} : vector<1x8x32xf32> to vector<1x8x4xf32>
    %134 = vector.shape_cast %133 : vector<1x8x4xf32> to vector<8x4xf32>
    %135 = vector.extract_strided_slice %29 {offsets = [0, 0, 24], sizes = [1, 16, 4], strides = [1, 1, 1]} : vector<1x16x32xf32> to vector<1x16x4xf32>
    %136 = vector.shape_cast %135 : vector<1x16x4xf32> to vector<16x4xf32>
    %137 = vector.extract_strided_slice %30 {offsets = [0, 0, 24], sizes = [1, 16, 4], strides = [1, 1, 1]} : vector<1x16x32xf32> to vector<1x16x4xf32>
    %138 = vector.shape_cast %137 : vector<1x16x4xf32> to vector<16x4xf32>
    %cst_50 = arith.constant dense<0.000000e+00> : vector<8x16xf32>
    %139 = tpu.matmul %134, %136, %cst_50 {dimension_numbers = #tpu.dot_dimension_numbers<[1], [1], [0], [0], [0, 0, 1, 0], [], []>} : vector<8x4xf32>, vector<16x4xf32>, vector<8x16xf32> -> vector<8x16xf32>
    %cst_51 = arith.constant dense<0xFF800000> : vector<8xf32>
    %140 = vector.multi_reduction <maximumf>, %139, %cst_51 [1] : vector<8x16xf32> to vector<8xf32>
    %141 = vector.shape_cast %140 : vector<8xf32> to vector<8x1xf32>
    %142 = vector.broadcast %141 : vector<8x1xf32> to vector<8x16xf32>
    %143 = arith.subf %139, %142 : vector<8x16xf32>
    %144 = math.exp %143 : vector<8x16xf32>
    %cst_52 = arith.constant dense<0.000000e+00> : vector<8xf32>
    %145 = vector.multi_reduction <add>, %144, %cst_52 [1] : vector<8x16xf32> to vector<8xf32>
    %146 = vector.shape_cast %145 : vector<8xf32> to vector<8x1xf32>
    %147 = vector.broadcast %146 : vector<8x1xf32> to vector<8x16xf32>
    %148 = arith.divf %144, %147 : vector<8x16xf32>
    %cst_53 = arith.constant dense<0.000000e+00> : vector<8x4xf32>
    %149 = tpu.matmul %148, %138, %cst_53 {dimension_numbers = #tpu.dot_dimension_numbers<[1], [0], [0], [1], [0, 0, 1, 1], [], []>} : vector<8x16xf32>, vector<16x4xf32>, vector<8x4xf32> -> vector<8x4xf32>
    %150 = vector.extract_strided_slice %28 {offsets = [0, 0, 28], sizes = [1, 8, 4], strides = [1, 1, 1]} : vector<1x8x32xf32> to vector<1x8x4xf32>
    %151 = vector.shape_cast %150 : vector<1x8x4xf32> to vector<8x4xf32>
    %152 = vector.extract_strided_slice %29 {offsets = [0, 0, 28], sizes = [1, 16, 4], strides = [1, 1, 1]} : vector<1x16x32xf32> to vector<1x16x4xf32>
    %153 = vector.shape_cast %152 : vector<1x16x4xf32> to vector<16x4xf32>
    %154 = vector.extract_strided_slice %30 {offsets = [0, 0, 28], sizes = [1, 16, 4], strides = [1, 1, 1]} : vector<1x16x32xf32> to vector<1x16x4xf32>
    %155 = vector.shape_cast %154 : vector<1x16x4xf32> to vector<16x4xf32>
    %cst_54 = arith.constant dense<0.000000e+00> : vector<8x16xf32>
    %156 = tpu.matmul %151, %153, %cst_54 {dimension_numbers = #tpu.dot_dimension_numbers<[1], [1], [0], [0], [0, 0, 1, 0], [], []>} : vector<8x4xf32>, vector<16x4xf32>, vector<8x16xf32> -> vector<8x16xf32>
    %cst_55 = arith.constant dense<0xFF800000> : vector<8xf32>
    %157 = vector.multi_reduction <maximumf>, %156, %cst_55 [1] : vector<8x16xf32> to vector<8xf32>
    %158 = vector.shape_cast %157 : vector<8xf32> to vector<8x1xf32>
    %159 = vector.broadcast %158 : vector<8x1xf32> to vector<8x16xf32>
    %160 = arith.subf %156, %159 : vector<8x16xf32>
    %161 = math.exp %160 : vector<8x16xf32>
    %cst_56 = arith.constant dense<0.000000e+00> : vector<8xf32>
    %162 = vector.multi_reduction <add>, %161, %cst_56 [1] : vector<8x16xf32> to vector<8xf32>
    %163 = vector.shape_cast %162 : vector<8xf32> to vector<8x1xf32>
    %164 = vector.broadcast %163 : vector<8x1xf32> to vector<8x16xf32>
    %165 = arith.divf %161, %164 : vector<8x16xf32>
    %cst_57 = arith.constant dense<0.000000e+00> : vector<8x4xf32>
    %166 = tpu.matmul %165, %155, %cst_57 {dimension_numbers = #tpu.dot_dimension_numbers<[1], [0], [0], [1], [0, 0, 1, 1], [], []>} : vector<8x16xf32>, vector<16x4xf32>, vector<8x4xf32> -> vector<8x4xf32>
    %167 = tpu.concatenate %47, %64, %81, %98, %115, %132, %149, %166 in 1 : vector<8x4xf32>, vector<8x4xf32>, vector<8x4xf32>, vector<8x4xf32>, vector<8x4xf32>, vector<8x4xf32>, vector<8x4xf32>, vector<8x4xf32> -> vector<8x32xf32>
    %c0_58 = arith.constant 0 : index
    %c0_59 = arith.constant 0 : index
    %c0_60 = arith.constant 0 : index
    %168 = vector.load %arg10[%c0_58, %c0_59, %c0_60] : memref<1x32x32xf32, #tpu.memory_space<vmem>>, vector<1x32x32xf32>
    %169 = vector.shape_cast %168 : vector<1x32x32xf32> to vector<32x32xf32>
    %cst_61 = arith.constant dense<0.000000e+00> : vector<8x32xf32>
    %170 = tpu.matmul %167, %169, %cst_61 {dimension_numbers = #tpu.dot_dimension_numbers<[1], [0], [0], [1], [0, 0, 1, 1], [], []>} : vector<8x32xf32>, vector<32x32xf32>, vector<8x32xf32> -> vector<8x32xf32>
    %c0_62 = arith.constant 0 : index
    %c0_63 = arith.constant 0 : index
    %c0_64 = arith.constant 0 : index
    %171 = vector.load %arg11[%c0_62, %c0_63, %c0_64] : memref<1x1x32xf32, #tpu.memory_space<vmem>>, vector<1x1x32xf32>
    %172 = vector.shape_cast %171 : vector<1x1x32xf32> to vector<1x32xf32>
    %173 = vector.broadcast %172 : vector<1x32xf32> to vector<8x32xf32>
    %174 = arith.addf %170, %173 : vector<8x32xf32>
    %175 = vector.shape_cast %174 : vector<8x32xf32> to vector<1x8x32xf32>
    %176 = arith.addf %3, %175 : vector<1x8x32xf32>
    %c2_i32 = arith.constant 2 : i32
    %177 = arith.cmpi slt, %arg1, %c2_i32 : i32
    %178 = arith.extui %177 : i1 to i32
    %c0_i32_65 = arith.constant 0 : i32
    %179 = arith.cmpi ne, %178, %c0_i32_65 : i32
    scf.if %179 {
      %cst_68 = arith.constant dense<0.000000e+00> : vector<1x8xf32>
      %183 = vector.multi_reduction <add>, %176, %cst_68 [2] : vector<1x8x32xf32> to vector<1x8xf32>
      %184 = vector.shape_cast %183 : vector<1x8xf32> to vector<1x8x1xf32>
      %cst_69 = arith.constant 3.200000e+01 : f32
      %185 = vector.broadcast %cst_69 : f32 to vector<1x8x1xf32>
      %186 = arith.divf %184, %185 : vector<1x8x1xf32>
      %187 = vector.broadcast %186 : vector<1x8x1xf32> to vector<1x8x32xf32>
      %188 = arith.subf %176, %187 : vector<1x8x32xf32>
      %189 = arith.mulf %188, %188 : vector<1x8x32xf32>
      %cst_70 = arith.constant dense<0.000000e+00> : vector<1x8xf32>
      %190 = vector.multi_reduction <add>, %189, %cst_70 [2] : vector<1x8x32xf32> to vector<1x8xf32>
      %191 = vector.shape_cast %190 : vector<1x8xf32> to vector<1x8x1xf32>
      %cst_71 = arith.constant 3.200000e+01 : f32
      %192 = vector.broadcast %cst_71 : f32 to vector<1x8x1xf32>
      %193 = arith.divf %191, %192 : vector<1x8x1xf32>
      %194 = vector.broadcast %186 : vector<1x8x1xf32> to vector<1x8x32xf32>
      %195 = arith.subf %176, %194 : vector<1x8x32xf32>
      %cst_72 = arith.constant 9.99999974E-6 : f32
      %196 = vector.broadcast %cst_72 : f32 to vector<1x8x1xf32>
      %197 = arith.addf %193, %196 : vector<1x8x1xf32>
      %198 = math.rsqrt %197 : vector<1x8x1xf32>
      %199 = vector.broadcast %198 : vector<1x8x1xf32> to vector<1x8x32xf32>
      %200 = arith.mulf %195, %199 : vector<1x8x32xf32>
      %c0_73 = arith.constant 0 : index
      %c0_74 = arith.constant 0 : index
      %c0_75 = arith.constant 0 : index
      %201 = vector.load %arg12[%c0_73, %c0_74, %c0_75] : memref<1x1x32xf32, #tpu.memory_space<vmem>>, vector<1x1x32xf32>
      %202 = vector.shape_cast %201 : vector<1x1x32xf32> to vector<1x32xf32>
      %203 = vector.shape_cast %202 : vector<1x32xf32> to vector<1x1x32xf32>
      %204 = vector.broadcast %203 : vector<1x1x32xf32> to vector<1x8x32xf32>
      %205 = arith.mulf %200, %204 : vector<1x8x32xf32>
      %c0_76 = arith.constant 0 : index
      %c0_77 = arith.constant 0 : index
      %c0_78 = arith.constant 0 : index
      %206 = vector.load %arg13[%c0_76, %c0_77, %c0_78] : memref<1x1x32xf32, #tpu.memory_space<vmem>>, vector<1x1x32xf32>
      %207 = vector.shape_cast %206 : vector<1x1x32xf32> to vector<1x32xf32>
      %208 = vector.shape_cast %207 : vector<1x32xf32> to vector<1x1x32xf32>
      %209 = vector.broadcast %208 : vector<1x1x32xf32> to vector<1x8x32xf32>
      %210 = arith.addf %205, %209 : vector<1x8x32xf32>
      %c0_79 = arith.constant 0 : index
      %c0_80 = arith.constant 0 : index
      %c0_81 = arith.constant 0 : index
      %211 = vector.load %arg15[%c0_79, %c0_80, %c0_81] : memref<1x8x32xf32, #tpu.memory_space<vmem>>, vector<1x8x32xf32>
      tpu.vector_store %arg15[%c0_79, %c0_80, %c0_81], %210 {strides = array<i32>} : memref<1x8x32xf32, #tpu.memory_space<vmem>>, vector<1x8x32xf32>,
    } else {
    }
    %c2_i32_66 = arith.constant 2 : i32
    %180 = arith.cmpi eq, %arg1, %c2_i32_66 : i32
    %181 = arith.extui %180 : i1 to i32
    %c0_i32_67 = arith.constant 0 : i32
    %182 = arith.cmpi ne, %181, %c0_i32_67 : i32
    scf.if %182 {
      %c0_68 = arith.constant 0 : index
      %c0_69 = arith.constant 0 : index
      %c0_70 = arith.constant 0 : index
      %183 = vector.load %arg14[%c0_68, %c0_69, %c0_70] : memref<1x8x32xf32, #tpu.memory_space<vmem>>, vector<1x8x32xf32>
      tpu.vector_store %arg14[%c0_68, %c0_69, %c0_70], %176 {strides = array<i32>} : memref<1x8x32xf32, #tpu.memory_space<vmem>>, vector<1x8x32xf32>,
    } else {
    }
    return
  }
  func.func @transform_0(%arg0: i32, %arg1: i32) -> (i32, i32, i32) {
    %c0_i32 = arith.constant 0 : i32
    %c0_i32_0 = arith.constant 0 : i32
    %c0_i32_1 = arith.constant 0 : i32
    return %arg0, %c0_i32, %c0_i32_0 : i32, i32, i32
  }
  func.func @transform_1(%arg0: i32, %arg1: i32) -> (i32, i32, i32) {
    %c0_i32 = arith.constant 0 : i32
    %c0_i32_0 = arith.constant 0 : i32
    %c0_i32_1 = arith.constant 0 : i32
    return %arg0, %c0_i32, %c0_i32_0 : i32, i32, i32
  }
  func.func @transform_2(%arg0: i32, %arg1: i32) -> (i32, i32, i32) {
    %c0_i32 = arith.constant 0 : i32
    %c0_i32_0 = arith.constant 0 : i32
    %c0_i32_1 = arith.constant 0 : i32
    return %arg1, %c0_i32, %c0_i32_0 : i32, i32, i32
  }
  func.func @transform_3(%arg0: i32, %arg1: i32) -> (i32, i32, i32) {
    %c0_i32 = arith.constant 0 : i32
    %c0_i32_0 = arith.constant 0 : i32
    %c0_i32_1 = arith.constant 0 : i32
    return %arg1, %c0_i32, %c0_i32_0 : i32, i32, i32
  }
  func.func @transform_4(%arg0: i32, %arg1: i32) -> (i32, i32, i32) {
    %c0_i32 = arith.constant 0 : i32
    %c0_i32_0 = arith.constant 0 : i32
    %c0_i32_1 = arith.constant 0 : i32
    return %arg1, %c0_i32, %c0_i32_0 : i32, i32, i32
  }
  func.func @transform_5(%arg0: i32, %arg1: i32) -> (i32, i32, i32) {
    %c0_i32 = arith.constant 0 : i32
    %c0_i32_0 = arith.constant 0 : i32
    %c0_i32_1 = arith.constant 0 : i32
    return %arg1, %c0_i32, %c0_i32_0 : i32, i32, i32
  }
  func.func @transform_6(%arg0: i32, %arg1: i32) -> (i32, i32, i32) {
    %c0_i32 = arith.constant 0 : i32
    %c0_i32_0 = arith.constant 0 : i32
    %c0_i32_1 = arith.constant 0 : i32
    return %arg1, %c0_i32, %c0_i32_0 : i32, i32, i32
  }
  func.func @transform_7(%arg0: i32, %arg1: i32) -> (i32, i32, i32) {
    %c0_i32 = arith.constant 0 : i32
    %c0_i32_0 = arith.constant 0 : i32
    %c0_i32_1 = arith.constant 0 : i32
    return %arg1, %c0_i32, %c0_i32_0 : i32, i32, i32
  }
  func.func @transform_8(%arg0: i32, %arg1: i32) -> (i32, i32, i32) {
    %c0_i32 = arith.constant 0 : i32
    %c0_i32_0 = arith.constant 0 : i32
    %c0_i32_1 = arith.constant 0 : i32
    return %arg1, %c0_i32, %c0_i32_0 : i32, i32, i32
  }
  func.func @transform_9(%arg0: i32, %arg1: i32) -> (i32, i32, i32) {
    %c0_i32 = arith.constant 0 : i32
    %c0_i32_0 = arith.constant 0 : i32
    %c0_i32_1 = arith.constant 0 : i32
    return %arg1, %c0_i32, %c0_i32_0 : i32, i32, i32
  }
  func.func @transform_10(%arg0: i32, %arg1: i32) -> (i32, i32, i32) {
    %c0_i32 = arith.constant 0 : i32
    %c0_i32_0 = arith.constant 0 : i32
    %c0_i32_1 = arith.constant 0 : i32
    return %arg1, %c0_i32, %c0_i32_0 : i32, i32, i32
  }
  func.func @transform_11(%arg0: i32, %arg1: i32) -> (i32, i32, i32) {
    %c0_i32 = arith.constant 0 : i32
    %c0_i32_0 = arith.constant 0 : i32
    %c0_i32_1 = arith.constant 0 : i32
    return %arg1, %c0_i32, %c0_i32_0 : i32, i32, i32
  }
  func.func @transform_12(%arg0: i32, %arg1: i32) -> (i32, i32, i32) {
    %c0_i32 = arith.constant 0 : i32
    %c0_i32_0 = arith.constant 0 : i32
    %c0_i32_1 = arith.constant 0 : i32
    return %arg0, %c0_i32, %c0_i32_0 : i32, i32, i32
  }
}

</mosaic_0001>

<bundles_post_ra>
// kernel: tpu_custom_call.1
= control target key start
LH: loop header
LB: loop body
LE: loop exit
PB: predicated region body
PF: predicated region fallthrough
CT: control target
= control target key end

     0   :  { %s4577_s0 = inlined_call_operand.hbm [shape: f32[2,8,32], index: 0, kind: input, shape index: {}]   ;;  %s4578_s1 = inlined_call_operand.hbm [shape: f32[2,16,32], index: 1, kind: input, shape index: {}]   ;;  %s4579_s2 = inlined_call_operand.hbm [shape: f32[3,32,32], index: 2, kind: input, shape index: {}]   ;;  %s4580_s3 = inlined_call_operand.hbm [shape: f32[3,32,32], index: 3, kind: input, shape index: {}]   ;;  %s4581_s4 = inlined_call_operand.hbm [shape: f32[3,32,32], index: 4, kind: input, shape index: {}]   ;;  %s4582_s5 = inlined_call_operand.vmem [shape: f32[3,1,32], index: 5, kind: input, shape index: {}]   ;;  %s4583_s6 = inlined_call_operand.vmem [shape: f32[3,1,32], index: 6, kind: input, shape index: {}]   ;;  %s4584_s7 = inlined_call_operand.vmem [shape: f32[3,1,32], index: 7, kind: input, shape index: {}]   ;;  %s4585_s8 = inlined_call_operand.hbm [shape: f32[3,32,32], index: 8, kind: input, shape index: {}]   ;;  %s4586_s9 = inlined_call_operand.vmem [shape: f32[3,1,32], index: 9, kind: input, shape index: {}]   ;;  %s4587_s10 = inlined_call_operand.vmem [shape: f32[3,1,32], index: 10, kind: input, shape index: {}]   ;;  %s4588_s11 = inlined_call_operand.vmem [shape: f32[3,1,32], index: 11, kind: input, shape index: {}]   ;;  %s4589_s12 = inlined_call_operand.hbm [shape: f32[2,8,32], index: 12, kind: output, shape index: {}]  }
   0x1   :  { %4627 = sst [smem:[#allocation38_spill]] %s4577_s0 }
   0x2   :  { %4628 = sst [smem:[#allocation39_spill]] %s4578_s1 }
   0x3   :  { %4629 = sst [smem:[#allocation40_spill]] %s4579_s2 }
   0x4   :  { %4630 = sst [smem:[#allocation41_spill]] %s4580_s3 }
   0x5   :  { %4631 = sst [smem:[#allocation42_spill]] %s4581_s4 }
   0x6   :  { %4632 = sst [smem:[#allocation43_spill]] %s4582_s5 }
   0x7   :  { %4633 = sst [smem:[#allocation44_spill]] %s4583_s6 }
   0x8   :  { %4634 = sst [smem:[#allocation45_spill]] %s4584_s7 }
   0x9   :  { %4635 = sst [smem:[#allocation46_spill]] %s4585_s8 }
   0xa   :  { %4636 = sst [smem:[#allocation47_spill]] %s4586_s9 }
   0xb   :  { %4637 = sst [smem:[#allocation48_spill]] %s4587_s10 }
   0xc   :  { %4638 = sst [smem:[#allocation49_spill]] %s4588_s11 }
   0xd   :  { %4639 = sst [smem:[#allocation50_spill]] %s4589_s12 }
   0xe   :  { %17 = vsyncpa [#allocation4], 0 }
   0xf   :  { %19 = vsyncpa [#allocation4 + $0x1], 0 }
  0x10   :  { %20 = vsyncpa [#allocation7], 0 }
  0x11   :  { %22 = vsyncpa [#allocation7 + $0x1], 0 }
  0x12   :  { %23 = vsyncpa [#allocation10], 0 }
  0x13   :  { %25 = vsyncpa [#allocation10 + $0x1], 0 }
  0x14   :  { %26 = vsyncpa [#allocation13], 0 }
  0x15   :  { %28 = vsyncpa [#allocation13 + $0x1], 0 }
  0x16   :  { %29 = vsyncpa [#allocation5], 0 }
  0x17   :  { %31 = vsyncpa [#allocation5 + $0x1], 0  ;;  %s3842_s21 = smov 0   ;;  %s3844_s22 = smov 0  }
  0x18   :  { %s3846_s23 = smov 0   ;;  %s3848_s24 = smov 0  }
  0x19   :  { %s3850_s25 = smov 0   ;;  %s3852_s26 = smov 0  }
  0x1a   :  { %s3854_s27 = smov 0   ;;  %s3856_s28 = smov 0  }
  0x1b   :  { %s3858_s29 = smov 0   ;;  %s3860_s30 = smov 0  }
  0x1c   :  { %s3862_s13 = smov 0  }
  0x1d LB: > { %4640 = sst [smem:[#allocation21_spill]] %s3713_s22  ;;  %s3898_s14 = sadd.s32 4294967295, %s3749_s13   ;;  %s3749_s13 = sphi %s3862_s13, %s37_s13   ;;  %s3745_s30 = sphi %s3860_s30, %s4728_s30   ;;  %s3741_s29 = sphi %s3858_s29, %s4727_s29   ;;  %s3737_s28 = sphi %s3856_s28, %s4726_s28   ;;  %s3733_s27 = sphi %s3854_s27, %s4725_s27   ;;  %s3729_s26 = sphi %s3852_s26, %s4724_s26   ;;  %s3725_s25 = sphi %s3850_s25, %s4723_s25   ;;  %s3721_s24 = sphi %s3848_s24, %s4722_s24   ;;  %s3717_s23 = sphi %s3846_s23, %s4721_s23   ;;  %s3713_s22 = sphi %s3844_s22, %s4720_s22   ;;  %s3709_s21 = sphi %s3842_s21, %s4719_s21  }
  0x1e   : > { %4641 = sst [smem:[#allocation22_spill]] %s3717_s23  ;;  %s2787_s15 = sadd.s32 4294967294, %s3749_s13  }
  0x1f   : > { %4642 = sst [smem:[#allocation23_spill]] %s3721_s24  ;;  %p63_p0 = scmp.ne.s32.totalorder %s3729_s26, %s3725_s25 }
  0x20   : > { %4643 = sst [smem:[#allocation24_spill]] %s3725_s25  ;;  %p4597_p1 = scmp.eq.s32.totalorder %s3749_s13, 0 }
  0x21   : > { %4644 = sst [smem:[#allocation25_spill]] %s3729_s26  ;;  %p69_p2 = scmp.ne.s32.totalorder %s3725_s25, %s3721_s24 }
  0x22   : > { %4645 = sst [smem:[#allocation26_spill]] %s3733_s27  ;;  %p4596_p3 = scmp.eq.s32.totalorder %s3898_s14, 0 }
  0x23   : > { %4646 = sst [smem:[#allocation27_spill]] %s3737_s28  ;;  %p65_p4 = por %p4597_p1, %p63_p0 }
  0x24   : > { %4647 = sst [smem:[#allocation28_spill]] %s3741_s29  ;;  %p379_p5 = scmp.eq.s32.totalorder %s3898_s14, 5 }
  0x25   : > { %4648 = sst [smem:[#allocation29_spill]] %s3745_s30  ;;  %p3914_p6 = por %p4596_p3, %p69_p2 }
  0x26   : > { %4649 = sst [smem:[#allocation30_spill]] %s3749_s13  ;;  %p385_p7 = scmp.eq.s32.totalorder %s2787_s15, 5 }
  0x27   : > { %s4650_s18 = scalar_select %p3914_p6, 1, 0 }
  0x28   : > { %p3918_p8 = por %p379_p5, %p63_p0  ;;  %p3922_p9 = por %p385_p7, %p69_p2 }
  0x29   : > { %p4595_p10 = scmp.lt.s32.totalorder %s3749_s13, 6  ;;  %s3928_s17 = sand.u32 1, %s3729_s26  }
  0x2a   : > { %s4651_s19 = scalar_select %p3918_p8, 1, 0 }
  0x2b   : > { %s4653_s20 = scalar_select %p3922_p9, 1, 0 }
  0x2c   : > { %4652 = sst [smem:[#allocation31_spill]] %s4651_s19  ;;  %p3933_p11 = pnand %p4595_p10, %p65_p4 }
  0x2d   : > { %4654 = sst [smem:[#allocation32_spill]] %s4653_s20  ;;  %s2792_s15 = sshll.u32 %s3928_s17, 4 }
  0x2e   : > { %s4655_s24 = scalar_select %p3933_p11, 1, 0 }
  0x2f   : > { %s2866_s12 = sshll.u32 %s3745_s30, 8  ;;  %s4656_s1 = sld [smem:[#allocation39_spill]] }
  0x30   : > { %s427_s20 = scalar_lea.vmem [#allocation6], %s2792_s15  ;;  %s4657_s10 = sand.u32 1, %s3749_s13  }
  0x31   : > { %s434_s16 = sshll.u32 %s427_s20, 4  ;;  %s3949_s9 = scalar_lea.sflag [#allocation7], %s4657_s10  ;;  %s3944_s16 = int_to_ptr.vmem [resolvable:$true] %s434_s16 }
  0x32   : > { %p4609_p0 = pneg %p3933_p11 }
  0x35   : > { %s3942_s11 = scalar_lea.hbm %s4656_s1, %s2866_s12  ;;  %s3436_s19 = scalar_lea.hbm %s4656_s1, 512 }
  0x36   : > { %s3431_s7 = scalar_lea.hbm %s3942_s11, 256  ;;  %p3437_p5 = scmp.lt.u32.totalorder %s3942_s11, %s4656_s1 }
  0x37   : > { %p3432_p13 = scmp.ne.s32.totalorder %s3942_s11, %s3431_s7  ;;  %p3438_p7 = scmp.lt.u32.totalorder %s3436_s19, %s3431_s7 }
  0x38   : > { %p3440_p3 = scmp.lt.u32.totalorder %s3431_s7, %s3942_s11 }
  0x39   : > { %p3434_p2 = pnand %p4609_p0, %p3432_p13  ;;  %p3439_p10 = por %p3438_p7, %p3437_p5 }
  0x3b   : > { %p3435_p4 = pneg %p3434_p2  ;;  %p3441_p1 = por %p3440_p3, %p3439_p10 }
  0x3d   : > { %p3442_p12 = pnand %p3441_p1, %p3435_p4 }
  0x3f   : > { %3445 = shalt.err (!%p3442_p12)
}
  0x40   : > { %s3446_s10 = scalar_lea.vmem %s3944_s16, 256  ;;  %s3751_s12 = smov [#allocation6]  }
  0x41   : > { %p3447_p13 = scmp.ne.s32.totalorder %s3944_s16, %s3446_s10  ;;  %s3451_s28 = sshll.u32 %s3751_s12, 4  ;;  %s3452_s28 = int_to_ptr.vmem [resolvable:$false] %s3451_s28 }
  0x42   : > { %s3453_s15 = scalar_lea.vmem %s3452_s28, 512  ;;  %p3454_p8 = scmp.lt.s32.totalorder %s3944_s16, %s3452_s28 }
  0x43   : > { %p3449_p2 = pnand %p3447_p13, %p4609_p0  ;;  %p3455_p5 = scmp.lt.s32.totalorder %s3453_s15, %s3446_s10 }
  0x45   : > { %p3450_p9 = pneg %p3449_p2  ;;  %p3456_p7 = por %p3455_p5, %p3454_p8 }
  0x47   : > { %p3457_p3 = pnand %p3456_p7, %p3450_p9 }
  0x49   : > { %3460 = shalt.err (!%p3457_p3)
}
  0x4a   : > { %s4599_s7 = smov 128   ;;  %s4601_s19 = smov 8  }
  0x4b   : > { %3201 = dma.hbm_to_vmem [thread:$0]  (!%p3933_p11), %s3942_s11, 256, %s3944_s16, %s3949_s9, %s4599_s7, %s4599_s7, %s4601_s19  }
  0x4c   : > { %p562_p1 = scmp.lt.s32.totalorder %s3749_s13, 7  ;;  %p4658_p8 = scmp.ge.s32.totalorder %s3749_s13, 1 }
  0x4d   : > { %s46_s10 = sadd.s32 1, %s3741_s29  ;;  %s108_s12 = sadd.s32 1, %s3717_s23 }
  0x4e   : > { %p3983_p9 = pnand %p4658_p8, %p562_p1  ;;  %p47_p10 = scmp.ge.s32.totalorder %s46_s10, 3 }
  0x4f   : > { %p115_p12 = scmp.ne.s32.totalorder %s3717_s23, %s3713_s22  ;;  %p121_p4 = scmp.ne.s32.totalorder %s3713_s22, %s3709_s21 }
  0x50   : > { %s4659_s20 = scalar_select %p3983_p9, 1, 0 }
  0x51   : > { %s4604_s28 = sand.u32 1, %s3717_s23   ;;  %s4730_s10 = smov (%p47_p10, %s46_s10), 0 }
  0x52   : > { %4660 = sst [smem:[#allocation33_spill]] %s4730_s10  ;;  %s4661_s11 = sadd.s32 1, %s3745_s30 }
  0x53   : > { %s4732_s11 = smov (!%p47_p10, %s4661_s11), %s3745_s30  ;;  %s105_s16 = ssub.s32 %s3741_s29, %s4730_s10 }
  0x54   : > { %p4662_p13 = scmp.eq.s32.totalorder %s3749_s13, 0  ;;  %p51_p5 = scmp.ge.s32.totalorder %s4732_s11, 2 }
  0x55   : > { %p106_p7 = scmp.eq.s32.totalorder %s105_s16, 0  ;;  %p4663_p3 = scmp.eq.s32.totalorder %s3898_s14, 0 }
  0x56   : > { %p117_p2 = por %p115_p12, %p4662_p13  ;;  %s4011_s21 = sshll.u32 %s4604_s28, 5 }
  0x57   : > { %p4005_p1 = por %p121_p4, %p4663_p3  ;;  %s4734_s11 = smov (%p51_p5, %s4732_s11), 0 }
  0x58   : > { %4666 = sst [smem:[#allocation35_spill]] %s4734_s11  ;;  %s53_s19 = ssub.s32 %s3745_s30, %s4734_s11 }
  0x59   : > { %s4664_s15 = scalar_select %p4005_p1, 1, 0 }
  0x5a   : > { %s4016_s7 = scalar_select %p106_p7, %s3717_s23, %s108_s12  }
  0x5b   : > { %4665 = sst [smem:[#allocation34_spill]] %s4664_s15  ;;  %s4021_s1 = sshll.u32 %s3741_s29, 9 }
  0x5c   : > { %4667 = sst [smem:[#allocation36_spill]] %s4016_s7  ;;  %p54_p8 = scmp.eq.s32.totalorder %s53_s19, 0 }
  0x5d   : > { %p4668_p10 = scmp.lt.s32.totalorder %s3749_s13, 6  ;;  %s4670_s10 = sadd.s32 1, %s3729_s26 }
  0x5e   : > { %s4032_s28 = scalar_select %p54_p8, %s3729_s26, %s4670_s10  }
  0x5f   : > { %p4025_p12 = pnand %p4668_p10, %p117_p2  ;;  %s4672_s3 = sld [smem:[#allocation41_spill]] }
  0x60   : > { %4671 = sst [smem:[#allocation37_spill]] %s4032_s28  ;;  %s469_s12 = scalar_lea.vmem [#allocation9], %s4011_s21 }
  0x61   : > { %s4669_s16 = scalar_select %p4025_p12, 1, 0 }
  0x62   : > { %s476_s19 = sshll.u32 %s469_s12, 4  ;;  %s4673_s11 = sand.u32 1, %s3749_s13   ;;  %s4041_s19 = int_to_ptr.vmem [resolvable:$true] %s476_s19 }
  0x63   : > { %s4045_s29 = scalar_lea.sflag [#allocation10], %s4673_s11  ;;  %p4051_p13 = pneg %p4025_p12 }
  0x65   : > { %s4038_s27 = scalar_lea.hbm %s4672_s3, %s4021_s1  ;;  %s3466_s12 = scalar_lea.hbm %s4672_s3, 1536 }
  0x66   : > { %s3461_s7 = scalar_lea.hbm %s4038_s27, 512  ;;  %p3467_p7 = scmp.lt.u32.totalorder %s4038_s27, %s4672_s3 }
  0x67   : > { %p3462_p4 = scmp.ne.s32.totalorder %s4038_s27, %s3461_s7  ;;  %p3468_p3 = scmp.lt.u32.totalorder %s3466_s12, %s3461_s7 }
  0x68   : > { %s4674_s10 = scalar_select %p4051_p13, 1, 0 }
  0x69   : > { %p3464_p2 = pnand %p4051_p13, %p3462_p4  ;;  %p3469_p8 = por %p3468_p3, %p3467_p7 }
  0x6a   : > { %p3470_p10 = scmp.lt.u32.totalorder %s3461_s7, %s4038_s27 }
  0x6b   : > { %p3465_p5 = pneg %p3464_p2 }
  0x6c   : > { %p3471_p0 = por %p3470_p10, %p3469_p8 }
  0x6e   : > { %p3472_p1 = pnand %p3471_p0, %p3465_p5 }
  0x70   : > { %3475 = shalt.err (!%p3472_p1)
}
  0x71   : > { %s3476_s11 = scalar_lea.vmem %s4041_s19, 512  ;;  %s3754_s5 = smov [#allocation9]  }
  0x72   : > { %p3477_p4 = scmp.ne.s32.totalorder %s4041_s19, %s3476_s11  ;;  %s3481_s6 = sshll.u32 %s3754_s5, 4  ;;  %s3482_s6 = int_to_ptr.vmem [resolvable:$false] %s3481_s6 }
  0x73   : > { %s3483_s26 = scalar_lea.vmem %s3482_s6, 1024  ;;  %p3484_p9 = scmp.lt.s32.totalorder %s4041_s19, %s3482_s6 }
  0x74   : > { %p3479_p2 = pnand %p3477_p4, %p4051_p13  ;;  %p3485_p11 = scmp.lt.s32.totalorder %s3483_s26, %s3476_s11 }
  0x76   : > { %p3480_p6 = pneg %p3479_p2  ;;  %p3486_p7 = por %p3485_p11, %p3484_p9 }
  0x78   : > { %p3487_p3 = pnand %p3486_p7, %p3480_p6 }
  0x7a   : > { %3490 = shalt.err (!%p3487_p3)
}
  0x7b   : > { %s4675_s7 = smov 8   ;;  %s4676_s28 = smov 128  }
  0x7c   : > { %3207 = dma.hbm_to_vmem [thread:$0]  (!%p4025_p12), %s4038_s27, 512, %s4041_s19, %s4045_s29, %s4676_s28, %s4676_s28, %s4675_s7  }
  0x7d   : > { %s2790_s12 = sshll.u32 %s3928_s17, 3  ;;  %s2791_s5 = sshll.u32 %s3745_s30, 7 }
  0x7e   : > { %s4677_s0 = sld [smem:[#allocation38_spill]]  ;;  %s409_s3 = scalar_lea.vmem [#allocation3], %s2790_s12 }
  0x7f   : > { %s416_s13 = sshll.u32 %s409_s3, 4  ;;  %s406_s15 = scalar_lea.sflag [#allocation4], %s3928_s17  ;;  %s417_s13 = int_to_ptr.vmem [resolvable:$true] %s416_s13 }
  0x80   : > { %p4678_p11 = scmp.ne.s32.totalorder %s4655_s24, 0 }
  0x82   : > { %p4679_p0 = pneg %p4678_p11 }
  0x84   : > { %s4083_s26 = scalar_lea.hbm %s4677_s0, %s2791_s5  ;;  %s3496_s6 = scalar_lea.hbm %s4677_s0, 256 }
  0x85   : > { %s3491_s22 = scalar_lea.hbm %s4083_s26, 128  ;;  %p3497_p5 = scmp.lt.u32.totalorder %s4083_s26, %s4677_s0 }
  0x86   : > { %p3492_p6 = scmp.ne.s32.totalorder %s4083_s26, %s3491_s22  ;;  %p3498_p8 = scmp.lt.u32.totalorder %s3496_s6, %s3491_s22 }
  0x87   : > { %p3500_p4 = scmp.lt.u32.totalorder %s3491_s22, %s4083_s26 }
  0x88   : > { %p3494_p9 = pnand %p3492_p6, %p4679_p0  ;;  %p3499_p10 = por %p3498_p8, %p3497_p5 }
  0x8a   : > { %p3495_p1 = pneg %p3494_p9  ;;  %p3501_p2 = por %p3500_p4, %p3499_p10 }
  0x8c   : > { %p3502_p7 = pnand %p3501_p2, %p3495_p1 }
  0x8e   : > { %3505 = shalt.err (!%p3502_p7)
}
  0x8f   : > { %s3506_s3 = scalar_lea.vmem %s417_s13, 128  ;;  %p4680_p6 = pmov %p4679_p0 }
  0x90   : > { %p3507_p3 = scmp.ne.s32.totalorder %s417_s13, %s3506_s3  ;;  %s3755_s17 = smov [#allocation3]  }
  0x91   : > { %s3511_s12 = sshll.u32 %s3755_s17, 4  ;;  %s3512_s12 = int_to_ptr.vmem [resolvable:$false] %s3511_s12 }
  0x92   : > { %p3509_p0 = pnand %p3507_p3, %p4680_p6  ;;  %s3513_s27 = scalar_lea.vmem %s3512_s12, 256 }
  0x93   : > { %p3514_p12 = scmp.lt.s32.totalorder %s417_s13, %s3512_s12  ;;  %p3515_p13 = scmp.lt.s32.totalorder %s3513_s27, %s3506_s3 }
  0x94   : > { %p3510_p9 = pneg %p3509_p0 }
  0x95   : > { %p3516_p5 = por %p3515_p13, %p3514_p12 }
  0x97   : > { %p3517_p8 = pnand %p3516_p5, %p3510_p9 }
  0x99   : > { %3520 = shalt.err (!%p3517_p8)
}
  0x9a   : > { %3198 = dma.hbm_to_vmem [thread:$0]  (!%p4678_p11), %s4083_s26, 128, %s417_s13, %s406_s15  }
  0x9b   : > { %s4681_s2 = sld [smem:[#allocation40_spill]]  ;;  %s448_s5 = scalar_lea.vmem [#allocation8], %s4011_s21 }
  0x9c   : > { %s455_s11 = sshll.u32 %s448_s5, 4  ;;  %p4682_p13 = scmp.ne.s32.totalorder %s4674_s10, 0  ;;  %s4112_s11 = int_to_ptr.vmem [resolvable:$true] %s455_s11 }
  0xa1   : > { %s4109_s6 = scalar_lea.hbm %s4681_s2, %s4021_s1  ;;  %s3526_s15 = scalar_lea.hbm %s4681_s2, 1536 }
  0xa2   : > { %s3521_s3 = scalar_lea.hbm %s4109_s6, 512  ;;  %p3527_p11 = scmp.lt.u32.totalorder %s4109_s6, %s4681_s2 }
  0xa3   : > { %p3522_p12 = scmp.ne.s32.totalorder %s4109_s6, %s3521_s3  ;;  %p3528_p4 = scmp.lt.u32.totalorder %s3526_s15, %s3521_s3 }
  0xa4   : > { %p3530_p7 = scmp.lt.u32.totalorder %s3521_s3, %s4109_s6 }
  0xa5   : > { %p3524_p1 = pnand %p3522_p12, %p4682_p13  ;;  %p3529_p2 = por %p3528_p4, %p3527_p11 }
  0xa7   : > { %p3525_p10 = pneg %p3524_p1  ;;  %p3531_p3 = por %p3530_p7, %p3529_p2 }
  0xa9   : > { %p3532_p6 = pnand %p3531_p3, %p3525_p10 }
  0xab   : > { %3535 = shalt.err (!%p3532_p6)
}
  0xac   : > { %s3536_s12 = scalar_lea.vmem %s4112_s11, 512  ;;  %s3756_s27 = smov [#allocation8]  }
  0xad   : > { %p3537_p0 = scmp.ne.s32.totalorder %s4112_s11, %s3536_s12  ;;  %s3541_s22 = sshll.u32 %s3756_s27, 4  ;;  %s3542_s22 = int_to_ptr.vmem [resolvable:$false] %s3541_s22 }
  0xae   : > { %s3543_s19 = scalar_lea.vmem %s3542_s22, 1024  ;;  %p3544_p8 = scmp.lt.s32.totalorder %s4112_s11, %s3542_s22 }
  0xaf   : > { %p3539_p9 = pnand %p3537_p0, %p4682_p13  ;;  %p3545_p12 = scmp.lt.s32.totalorder %s3543_s19, %s3536_s12 }
  0xb1   : > { %p3540_p5 = pneg %p3539_p9  ;;  %p3546_p1 = por %p3545_p12, %p3544_p8 }
  0xb3   : > { %p3547_p11 = pnand %p3546_p1, %p3540_p5 }
  0xb5   : > { %3550 = shalt.err (!%p3547_p11)
}
  0xb6   : > { %p4683_p10 = scmp.ne.s32.totalorder %s4669_s16, 0  ;;  %s4684_s4 = sld [smem:[#allocation42_spill]] }
  0xb7   : > { %s490_s13 = scalar_lea.vmem [#allocation11], %s4011_s21 }
  0xb8   : > { %3204 = dma.hbm_to_vmem [thread:$0]  (!%p4683_p10), %s4109_s6, 512, %s4112_s11, %s3949_s9, %s4676_s28, %s4676_s28, %s4675_s7  }
  0xb9   : > { %s497_s15 = sshll.u32 %s490_s13, 4  ;;  %s4146_s15 = int_to_ptr.vmem [resolvable:$true] %s497_s15 }
  0xbc   : > { %s4143_s24 = scalar_lea.hbm %s4684_s4, %s4021_s1  ;;  %s3556_s6 = scalar_lea.hbm %s4684_s4, 1536 }
  0xbd   : > { %s3551_s26 = scalar_lea.hbm %s4143_s24, 512  ;;  %p3557_p3 = scmp.lt.u32.totalorder %s4143_s24, %s4684_s4 }
  0xbe   : > { %p3552_p4 = scmp.ne.s32.totalorder %s4143_s24, %s3551_s26  ;;  %p3558_p6 = scmp.lt.u32.totalorder %s3556_s6, %s3551_s26 }
  0xbf   : > { %p3560_p9 = scmp.lt.u32.totalorder %s3551_s26, %s4143_s24 }
  0xc0   : > { %p3554_p2 = pnand %p3552_p4, %p4682_p13  ;;  %p3559_p0 = por %p3558_p6, %p3557_p3 }
  0xc2   : > { %p3555_p7 = pneg %p3554_p2  ;;  %p3561_p5 = por %p3560_p9, %p3559_p0 }
  0xc4   : > { %p3562_p8 = pnand %p3561_p5, %p3555_p7 }
  0xc6   : > { %3565 = shalt.err (!%p3562_p8)
}
  0xc7   : > { %s3566_s27 = scalar_lea.vmem %s4146_s15, 512  ;;  %s3757_s22 = smov [#allocation11]  }
  0xc8   : > { %p3567_p12 = scmp.ne.s32.totalorder %s4146_s15, %s3566_s27  ;;  %s3571_s19 = sshll.u32 %s3757_s22, 4  ;;  %s3572_s19 = int_to_ptr.vmem [resolvable:$false] %s3571_s19 }
  0xc9   : > { %s3573_s5 = scalar_lea.vmem %s3572_s19, 1024  ;;  %p3574_p4 = scmp.lt.s32.totalorder %s4146_s15, %s3572_s19 }
  0xca   : > { %p3569_p1 = pnand %p3567_p12, %p4682_p13  ;;  %p3575_p2 = scmp.lt.s32.totalorder %s3573_s5, %s3566_s27 }
  0xcc   : > { %p3570_p11 = pneg %p3569_p1  ;;  %p3576_p3 = por %p3575_p2, %p3574_p4 }
  0xce   : > { %p3577_p6 = pnand %p3576_p3, %p3570_p11 }
  0xd0   : > { %3580 = shalt.err (!%p3577_p6)
}
  0xd1   : > { %3210 = dma.hbm_to_vmem [thread:$0]  (!%p4683_p10), %s4143_s24, 512, %s4146_s15, %s4045_s29, %s4676_s28, %s4676_s28, %s4675_s7  }
  0xd2   : > { %s4685_s8 = sld [smem:[#allocation46_spill]]  ;;  %s529_s17 = scalar_lea.vmem [#allocation12], %s4011_s21 }
  0xd3   : > { %s536_s9 = sshll.u32 %s529_s17, 4  ;;  %s4686_s6 = sand.u32 1, %s3717_s23   ;;  %s4180_s9 = int_to_ptr.vmem [resolvable:$true] %s536_s9 }
  0xd4   : > { %s4184_s11 = scalar_lea.sflag [#allocation13], %s4686_s6 }
  0xd8   : > { %s4177_s26 = scalar_lea.hbm %s4685_s8, %s4021_s1  ;;  %s3586_s1 = scalar_lea.hbm %s4685_s8, 1536 }
  0xd9   : > { %s3581_s12 = scalar_lea.hbm %s4177_s26, 512  ;;  %p3587_p5 = scmp.lt.u32.totalorder %s4177_s26, %s4685_s8 }
  0xda   : > { %p3582_p7 = scmp.ne.s32.totalorder %s4177_s26, %s3581_s12  ;;  %p3588_p8 = scmp.lt.u32.totalorder %s3586_s1, %s3581_s12 }
  0xdb   : > { %p3590_p1 = scmp.lt.u32.totalorder %s3581_s12, %s4177_s26 }
  0xdc   : > { %p3584_p0 = pnand %p3582_p7, %p4682_p13  ;;  %p3589_p12 = por %p3588_p8, %p3587_p5 }
  0xde   : > { %p3585_p9 = pneg %p3584_p0  ;;  %p3591_p11 = por %p3590_p1, %p3589_p12 }
  0xe0   : > { %p3592_p4 = pnand %p3591_p11, %p3585_p9 }
  0xe2   : > { %3595 = shalt.err (!%p3592_p4)
}
  0xe3   : > { %s3596_s21 = scalar_lea.vmem %s4180_s9, 512  ;;  %s3758_s22 = smov [#allocation12]  }
  0xe4   : > { %p3597_p2 = scmp.ne.s32.totalorder %s4180_s9, %s3596_s21  ;;  %s3601_s19 = sshll.u32 %s3758_s22, 4  ;;  %s3602_s19 = int_to_ptr.vmem [resolvable:$false] %s3601_s19 }
  0xe5   : > { %s3603_s5 = scalar_lea.vmem %s3602_s19, 1024  ;;  %p3604_p7 = scmp.lt.s32.totalorder %s4180_s9, %s3602_s19 }
  0xe6   : > { %p3599_p3 = pnand %p3597_p2, %p4682_p13  ;;  %p3605_p0 = scmp.lt.s32.totalorder %s3603_s5, %s3596_s21 }
  0xe8   : > { %p3600_p6 = pneg %p3599_p3  ;;  %p3606_p5 = por %p3605_p0, %p3604_p7 }
  0xea   : > { %p3607_p8 = pnand %p3606_p5, %p3600_p6 }
  0xec   : > { %3610 = shalt.err (!%p3607_p8)
}
  0xed   : > { %3213 = dma.hbm_to_vmem [thread:$0]  (!%p4683_p10), %s4177_s26, 512, %s4180_s9, %s4184_s11, %s4676_s28, %s4676_s28, %s4675_s7  }
  0xee   : > { %p4687_p13 = scmp.ne.s32.totalorder %s4659_s20, 0 }
  0xef   : > { %s4214_s10 = sand.u32 (!%p4687_p13), 1, %s3725_s25   ;;  %p4688_p9 = scmp.ne.s32.totalorder (!%p4687_p13), %s4650_s18, 0 }
  0xf0   : > { %566 = sbr.rel (%p4687_p13) target bundleno = 5681 (0x1631), region = 68  ;;  %s4623_s3 = sshll.u32 (!%p4687_p13), %s4214_s10, 3 }
  0xf1   : > { %s569_s13 = scalar_lea.sflag (!%p4687_p13), [#allocation4], %s4214_s10  ;;  %s4220_s16 = scalar_lea.vmem (!%p4687_p13), [#allocation3], %s4623_s3 }
  0xf7   : > { %3684 = dma.done.wait (%p4688_p9), %s569_s13, 128  }
  0xf8   : > { %3686 = vsyncadd (%p4688_p9), %s569_s13, 4294967168  ;;  %s577_s20 = sand.u32 1, %s3898_s14   ;;  %s2809_s7 = sshll.u32 %s4214_s10, 4 }
  0xf9   : > { %s578_s28 = scalar_lea.sflag [#allocation7], %s577_s20  ;;  %s4228_s26 = scalar_lea.vmem [#allocation6], %s2809_s7 }
  0xfa   : > { %3688 = dma.done.wait (%p4688_p9), %s578_s28, 256  }
  0xfb   : > { %3690 = vsyncadd (%p4688_p9), %s578_s28, 4294967040  ;;  %s4689_s17 = sld [smem:[#allocation21_spill]] }
  0xfc   : > { %s4690_s9 = sld [smem:[#allocation34_spill]] }
 0x101   : > { %s588_s6 = sand.u32 1, %s4689_s17  }
 0x102   : > { %s2810_s11 = sshll.u32 %s588_s6, 5  ;;  %p4691_p10 = scmp.ne.s32.totalorder %s4690_s9, 0 }
 0x103   : > { %s4235_s12 = scalar_lea.vmem [#allocation8], %s2810_s11 }
 0x104   : > { %3692 = dma.done.wait (%p4691_p10), %s578_s28, 512  }
 0x105   : > { %3694 = vsyncadd (%p4691_p10), %s578_s28, 4294966784  ;;  %s596_s14 = scalar_lea.sflag [#allocation10], %s577_s20  ;;  %s599_s29 = scalar_lea.vmem [#allocation9], %s2810_s11 }
 0x106   : > { %3696 = dma.done.wait (%p4691_p10), %s596_s14, 1024  }
 0x107   : > { %3698 = vsyncadd (%p4691_p10), %s596_s14, 4294966272  ;;  %s4245_s18 = scalar_lea.vmem [#allocation11], %s2810_s11  ;;  %s614_s24 = scalar_lea.sflag [#allocation13], %s588_s6 }
 0x108   : > { %s4247_s1 = scalar_lea.vmem [#allocation12], %s2810_s11 }
 0x109   : > { %3700 = dma.done.wait (%p4691_p10), %s614_s24, 512  }
 0x10a   : > { %3702 = vsyncadd (%p4691_p10), %s614_s24, 4294966784  ;;  %s4692_s15 = sld [smem:[#allocation26_spill]]  ;;  %s4694_s7 = sld [smem:[#allocation44_spill]] }
 0x10b   : > { %s4695_s6 = sld [smem:[#allocation45_spill]]  ;;  %s4696_s3 = sld [smem:[#allocation47_spill]] }
 0x10c   : > { %s4697_s22 = sld [smem:[#allocation48_spill]]  ;;  %s4698_s25 = sld [smem:[#allocation49_spill]] }
 0x10d   : > { %s4699_s5 = sshll.u32 %s4214_s10, 3 }
 0x10e   : > { %s4283_s23 = scalar_lea.vmem [#allocation14], %s4699_s5 }
 0x110   : > { %p701_p12 = scmp.lt.s32.totalorder %s4692_s15, 2  ;;  %p2815_p1 = scmp.ne.s32.totalorder %s4692_s15, 0 }
 0x111   : > { %v723_v0 = vld [vmem:[%s4220_s16] sm:$0xff] (!%p2815_p1)  ;;  %vm724_vm0 = vcmask (!%p2815_p1), 261120  }
 0x112   : > { %s4255_s27 = scalar_select %p701_p12, %s4692_s15, 2 }
 0x113   : > { %722 = sbr.rel (%p2815_p1) target bundleno = 282 (0x11a), region = 96  ;;  %725 = vst.msk [vmem:[#allocation2] sm:$0xff] (!%p2815_p1), %vm724_vm0, %v723_v0 }
 0x114   : > { %s706_s28 = scalar_lea.vmem %s4694_s7, %s4255_s27  ;;  %s709_s11 = scalar_lea.vmem %s4695_s6, %s4255_s27 }
 0x115   : > { %s712_s0 = scalar_lea.vmem %s4696_s3, %s4255_s27  ;;  %s715_s4 = scalar_lea.vmem %s4697_s22, %s4255_s27 }
 0x116   : > { %s718_s19 = scalar_lea.vmem %s4698_s25, %s4255_s27 }
 0x11a PF: > { %v814_v1 = vld [vmem:[%s599_s29] sm:$0xff]  ;;  %v815_v2 = vld [vmem:[%s599_s29 + $0x8] sm:$0xff]  ;;  %v816_v3 = vld [vmem:[%s599_s29 + $0x10] sm:$0xff]  ;;  %vm740_vm1 = vcmask 261120   ;;  %v3759_v7 = vmov 0.0|0.0   ;;  %vm3760_vm2 = vmmov 0  }
 0x11b   : > { %v3103_v4 = vpack.c.bf16 %v815_v2, %v814_v1  ;;  %v817_v5 = vld [vmem:[%s599_s29 + $0x18] sm:$0xff]  ;;  %v727_v6 = vld [vmem:[%s4228_s26] sm:$0xff]  ;;  %3097 = vmatprep.subr.bf16.mxu0 %v3759_v7  ;;  %v730_v10 = vld [vmem:[%s4235_s12 + $0x8] sm:$0xff]  ;;  %v3761_v12 = vmov 0.0   ;;  %vm992_vm3 = vcmask 31744   ;;  %s4703_s16 = sld [smem:[#allocation43_spill]] }
 0x11c   : > { %v3107_v8 = vpack.c.bf16 %v817_v5, %v816_v3  ;;  %2960 = vmatprep.mubr.msk.f32.mxu1 %vm740_vm1, %v727_v6  ;;  %v729_v9 = vld [vmem:[%s4235_s12] sm:$0xff]  ;;  %v731_v11 = vld [vmem:[%s4235_s12 + $0x10] sm:$0xff]  ;;  %2949 = vmatprep.mubr.msk.f32.mxu0 %vm3760_vm2, %v3761_v12  ;;  %v732_v14 = vld [vmem:[%s4235_s12 + $0x18] sm:$0xff]  ;;  %s3762_s12 = smov 124   ;;  %vm1072_vm5 = vcmask 130048   ;;  %s3763_s5 = smov 120  }
 0x11d   : > { %3104 = vmatprep.subr.bf16.mxu1 %v3103_v4  ;;  %v3098_v13 = vpack.c.bf16 %v730_v10, %v729_v9  ;;  %v3101_v15 = vpack.c.bf16 %v732_v14, %v731_v11  ;;  %v728_v16 = vld [vmem:[%s4228_s26 + $0x8] sm:$0xff]  ;;  %vm4314_vm4 = vmpackc.low %vm992_vm3, %vm992_vm3  ;;  %v906_v30 = vld [vmem:[%s4245_s18] sm:$0xff]  ;;  %s3764_s13 = smov 116   ;;  %s3765_s20 = smov 112   ;;  %vm2392_vm6 = vcmask 64512   ;;  %vm2394_vm7 = vcmask 97280  }
 0x11e   : > { %3106 = vmatpush3.bf16.msra.mxu1 %v3103_v4  ;;  %v4298_v17 = vld [vmem:[#allocation2] sm:$0xff]  ;;  %v908_v32 = vld [vmem:[%s4245_s18 + $0x10] sm:$0xff]  ;;  %v909_v34 = vld [vmem:[%s4245_s18 + $0x18] sm:$0xff]  ;;  %s3766_s7 = smov 108   ;;  %s3768_s17 = smov 100   ;;  %vm2397_vm8 = vcmask 162816  }
 0x11f   : > { %3108 = vmatprep.subr.bf16.mxu1 %v3107_v8  ;;  %3099 = vmatpush3.bf16.msra.mxu0 %v3098_v13  ;;  %v2818_v18 = vld [vmem:[%s706_s28] ss:$0 sm:$0xff]  ;;  %v3115_v35 = vpack.c.bf16 %v909_v34, %v908_v32  ;;  %s3767_s28 = smov 104   ;;  %s3769_s9 = smov 4   ;;  %vm2399_vm9 = vcmask 195584   ;;  %vm2401_vm10 = vcmask 228352  }
 0x120   : > { %3100 = vmatprep.subr.bf16.mxu0 %v3759_v7  ;;  %v907_v31 = vld [vmem:[%s4245_s18 + $0x8] sm:$0xff]  ;;  %s3770_s6 = smov 8   ;;  %s3772_s14 = smov 20  }
 0x121   : > { %s4704_s26 = scalar_lea.vmem %s4703_s16, %s4255_s27  ;;  %v3111_v33 = vpack.c.bf16 %v907_v31, %v906_v30  ;;  %v2821_v46 = vld [vmem:[%s709_s11] ss:$0 sm:$0xff]  ;;  %s3771_s11 = smov 12  }
 0x122   : > { %3110 = vmatpush3.bf16.msra.mxu1 %v3107_v8  ;;  %v2816_v26 = vld [vmem:[%s4704_s26] ss:$0 sm:$0xff]  ;;  %s3773_s24 = smov 24   ;;  %s3774_s21 = smov 16  }
 0x123   : > { %3102 = vmatpush3.bf16.msra.mxu0 %v3101_v15  ;;  %3119 = vmatprep.subr.bf16.mxu1 %v3759_v7  ;;  %s3775_s22 = smov 28   ;;  %s4707_s25 = sld [smem:[#allocation26_spill]] }
 0x124   : > { %3112 = vmatprep.subr.bf16.mxu0 %v3111_v33 }
 0x125   : > { %2961 = vmatmul.mubr.msk.f32.vlgmr.msra.gmra.mrb[0].mxu1 %vm740_vm1, %v728_v16 }
 0x126   : > { %2950 = vmatmul.mubr.msk.f32.vlgmr.msra.gmra.mrb[0].mxu0 %vm740_vm1, %v4298_v17  ;;  %2978 = vmatprep.mubr.msk.f32.mxu1 %vm3760_vm2, %v3761_v12 }
 0x127   : > { %2971 = vmatprep.mubr.msk.f32.mxu0 %vm740_vm1, %v727_v6  ;;  %3114 = vmatpush3.bf16.msra.mxu0 %v3111_v33 }
 0x128   : > { %3116 = vmatprep.subr.bf16.mxu0 %v3115_v35 }
 0x129   : > { %p2858_p11 = scmp.ge.s32.totalorder %s4707_s25, 2 }
 0x12b   : > { %3118 = vmatpush3.bf16.msra.mxu0 %v3115_v35 }
 0x12c   : > { %3130 = vmatprep.subr.bf16.mxu0 %v3759_v7 }
 0x12e   : > { %2972 = vmatmul.mubr.msk.f32.vlgmr.msra.gmra.mrb[2].mxu0 %vm740_vm1, %v728_v16 }
 0x12f   : > { %2999 = vmatprep.mubr.msk.f32.mxu0 %vm3760_vm2, %v3761_v12 }
 0x1f8   : > { %v2962_v19 = vpop.f32.mrb[0].mxu1 }
 0x1f9   : > { %v903_v20 = vadd.f32 %v2962_v19, %v2818_v18  ;;  %v897_v21 = vpop.f32.mrb[1].mxu1  ;;  %v810_v22 = vpop.f32.mrb[0].mxu0 }
 0x1fa   : > { %v898_v23 = vadd.f32 %v2818_v18, %v897_v21  ;;  %v2951_v24 = vpop.f32.mrb[1].mxu0  ;;  %v4329_v29 = vadd.f32 %v2816_v26, %v810_v22 }
 0x1fc   : > { %v4323_v27 = vpack.i.bf16 %v903_v20, %v898_v23  ;;  %v3120_v28 = vpack.c.bf16 %v903_v20, %v898_v23 }
 0x1fe   : > { %3328 = vrot.lane.b32.xlu1 %v4323_v27, %s3762_s12  ;;  %3122 = vmatpush3.bf16.xpose.msk.msra.mxu1 %vm4314_vm4, %v3120_v28 }
 0x1ff   : > { %3123 = vmatprep.subr.bf16.mxu1 %v3759_v7 }
 0x201   : > { %v2973_v39 = vpop.f32.mrb[2].mxu0 }
 0x202   : > { %1157 = vrot.lane.b32.xlu1 %v4329_v29, %s3762_s12  ;;  %v983_v40 = vpop.f32.mrb[3].mxu0  ;;  %v989_v47 = vadd.f32 %v2973_v39, %v2821_v46 }
 0x203   : > { %v984_v48 = vadd.f32 %v2821_v46, %v983_v40 }
 0x205   : > { %2979 = vmatmul.mubr.msk.f32.vlgmr.msra.gmra.mrb[2].mxu1 %vm992_vm3, %v4329_v29  ;;  %v3124_v49 = vpack.c.bf16 %v989_v47, %v984_v48  ;;  %v4353_v50 = vpack.i.bf16 %v989_v47, %v984_v48 }
 0x206   : > { %2985 = vmatprep.mubr.msk.f32.mxu1 %vm3760_vm2, %v3761_v12 }
 0x207   : > { %3125 = vmatpush3.bf16.msra.mxu1 %v3124_v49 }
 0x208   : > { %3126 = vmatprep.subr.bf16.mxu1 %v3759_v7 }
 0x270   : > { %v3329_v52 = vpop.permute.xlu1 %3328 }
 0x271   : > { %v3331_v53 = vunpack.i.h.bf16 %v3329_v52  ;;  %v3330_v54 = vunpack.i.l.bf16 %v3329_v52 }
 0x273   : > { %v3127_v57 = vpack.c.bf16 %v3331_v53, %v3330_v54 }
 0x274   : > { %v1158_v58 = vpop.permute.xlu1 %1157 }
 0x2d8   : > { %v1068_v36 = vpop.f32.mrb[2].mxu1 }
 0x2d9   : > { %v2980_v37 = vpop.f32.mrb[3].mxu1  ;;  %v1073_v38 = vsel %vm1072_vm5, %v1068_v36, -inf }
 0x2da   : > { %1074 = vmax.xlane.f32.xlu0 %v1073_v38 }
 0x367   : > { %v1075_v41 = vpop.xlane.xlu0 %1074 }
 0x368   : > { %v1076_v42 = vsub.f32 %v1068_v36, %v1075_v41 }
 0x36a   : > { %v1077_v43 = vmul.f32 1.442695, %v1076_v42 }
 0x36c   : > { %3397 = vpow2.f32 %v1077_v43 }
 0x376   : > { %v3398_v44 = vpop.eup %3397 }
 0x377   : > { %v1079_v45 = vsel %vm1072_vm5, %v3398_v44, 0.0 }
 0x378   : > { %1080 = vadd.xlane.f32.xlu0 %v1079_v45 }
 0x405   : > { %v1081_v51 = vpop.xlane.xlu0 %1080 }
 0x406   : > { %3399 = vrcp.f32 %v1081_v51 }
 0x410   : > { %v3400_v55 = vpop.eup %3399 }
 0x411   : > { %v1083_v56 = vmul.f32 %v3400_v55, %v3398_v44 }
 0x413   : > { %2986 = vmatmul.mubr.msk.f32.vlgmr.msra.gmra.mrb[4].mxu1 %vm1072_vm5, %v1083_v56 }
 0x414   : > { %3129 = vmatpush3.bf16.xpose.msk.msra.mxu1 %vm4314_vm4, %v3127_v57  ;;  %2992 = vmatprep.mubr.msk.f32.mxu1 %vm3760_vm2, %v3761_v12 }
 0x415   : > { %3137 = vmatprep.subr.bf16.mxu1 %v3759_v7 }
 0x41b   : > { %2993 = vmatmul.mubr.msk.f32.vlgmr.msra.gmra.mrb[6].mxu1 %vm992_vm3, %v1158_v58 }
 0x41c   : > { %3013 = vmatprep.mubr.msk.f32.mxu1 %vm3760_vm2, %v3761_v12 }
 0x4e6   : > { %v4365_v59 = vpop.f32.mrb[4].mxu1 }
 0x4e7   : > { %v2987_v60 = vpop.f32.mrb[5].mxu1 }
 0x4ee   : > { %v1235_v61 = vpop.f32.mrb[6].mxu1 }
 0x4ef   : > { %v2994_v62 = vpop.f32.mrb[7].mxu1  ;;  %v1239_v63 = vsel %vm1072_vm5, %v1235_v61, -inf }
 0x4f0   : > { %1240 = vmax.xlane.f32.xlu0 %v1239_v63 }
 0x506   : > { %3333 = vrot.lane.b32.xlu0 %v4353_v50, %s3762_s12 }
 0x50a   : > { %3338 = vrot.lane.b32.xlu0 %v4323_v27, %s3763_s5 }
 0x50e   : > { %1331 = vrot.lane.b32.xlu0 %v4329_v29, %s3763_s5 }
 0x57d   : > { %v1241_v0 = vpop.xlane.xlu0 %1240 }
 0x57e   : > { %v1242_v1 = vsub.f32 %v1235_v61, %v1241_v0 }
 0x580   : > { %v1243_v2 = vmul.f32 1.442695, %v1242_v1 }
 0x581   : > { %v3334_v3 = vpop.permute.xlu0 %3333 }
 0x582   : > { %3401 = vpow2.f32 %v1243_v2  ;;  %v3336_v4 = vunpack.i.h.bf16 %v3334_v3  ;;  %v3335_v5 = vunpack.i.l.bf16 %v3334_v3 }
 0x584   : > { %v3131_v6 = vpack.c.bf16 %v3336_v4, %v3335_v5 }
 0x585   : > { %v3339_v15 = vpop.permute.xlu0 %3338 }
 0x586   : > { %3132 = vmatpush3.bf16.msra.mxu0 %v3131_v6  ;;  %v3341_v18 = vunpack.i.h.bf16 %v3339_v15  ;;  %v3340_v19 = vunpack.i.l.bf16 %v3339_v15 }
 0x587   : > { %3133 = vmatprep.subr.bf16.mxu0 %v3759_v7 }
 0x588   : > { %v3134_v22 = vpack.c.bf16 %v3341_v18, %v3340_v19 }
 0x589   : > { %v1332_v23 = vpop.permute.xlu0 %1331 }
 0x58c   : > { %v3402_v8 = vpop.eup %3401 }
 0x58d   : > { %v1245_v9 = vsel %vm1072_vm5, %v3402_v8, 0.0 }
 0x58e   : > { %1246 = vadd.xlane.f32.xlu1 %v1245_v9 }
 0x59f   : > { %3343 = vrot.lane.b32.xlu1 %v4353_v50, %s3763_s5 }
 0x5a3   : > { %3348 = vrot.lane.b32.xlu1 %v4323_v27, %s3764_s13 }
 0x61b   : > { %v1247_v10 = vpop.xlane.xlu1 %1246 }
 0x61c   : > { %3403 = vrcp.f32 %v1247_v10 }
 0x61f   : > { %v3344_v11 = vpop.permute.xlu1 %3343 }
 0x620   : > { %v3346_v13 = vunpack.i.h.bf16 %v3344_v11  ;;  %v3345_v14 = vunpack.i.l.bf16 %v3344_v11 }
 0x622   : > { %v3138_v16 = vpack.c.bf16 %v3346_v13, %v3345_v14 }
 0x623   : > { %v3349_v37 = vpop.permute.xlu1 %3348 }
 0x624   : > { %3139 = vmatpush3.bf16.msra.mxu1 %v3138_v16  ;;  %v3351_v39 = vunpack.i.h.bf16 %v3349_v37  ;;  %v3350_v40 = vunpack.i.l.bf16 %v3349_v37 }
 0x625   : > { %3140 = vmatprep.subr.bf16.mxu1 %v3759_v7 }
 0x626   : > { %v3404_v20 = vpop.eup %3403  ;;  %v3141_v43 = vpack.c.bf16 %v3351_v39, %v3350_v40 }
 0x627   : > { %v1249_v21 = vmul.f32 %v3404_v20, %v3402_v8 }
 0x629   : > { %3000 = vmatmul.mubr.msk.f32.vlgmr.msra.gmra.mrb[4].mxu0 %vm1072_vm5, %v1249_v21 }
 0x62a   : > { %3136 = vmatpush3.bf16.xpose.msk.msra.mxu0 %vm4314_vm4, %v3134_v22  ;;  %3006 = vmatprep.mubr.msk.f32.mxu0 %vm3760_vm2, %v3761_v12 }
 0x62b   : > { %3144 = vmatprep.subr.bf16.mxu0 %v3759_v7 }
 0x631   : > { %3007 = vmatmul.mubr.msk.f32.vlgmr.msra.gmra.mrb[6].mxu0 %vm992_vm3, %v1332_v23 }
 0x632   : > { %3027 = vmatprep.mubr.msk.f32.mxu0 %vm3760_vm2, %v3761_v12 }
 0x6fc   : > { %v4387_v24 = vpop.f32.mrb[4].mxu0 }
 0x6fd   : > { %v3001_v26 = vpop.f32.mrb[5].mxu0 }
 0x704   : > { %v1409_v28 = vpop.f32.mrb[6].mxu0 }
 0x705   : > { %v3008_v30 = vpop.f32.mrb[7].mxu0  ;;  %v1413_v31 = vsel %vm1072_vm5, %v1409_v28, -inf }
 0x706   : > { %1414 = vmax.xlane.f32.xlu0 %v1413_v31 }
 0x793   : > { %v1415_v32 = vpop.xlane.xlu0 %1414 }
 0x794   : > { %v1416_v33 = vsub.f32 %v1409_v28, %v1415_v32 }
 0x796   : > { %v1417_v34 = vmul.f32 1.442695, %v1416_v33 }
 0x798   : > { %3405 = vpow2.f32 %v1417_v34 }
 0x7a2   : > { %v3406_v35 = vpop.eup %3405 }
 0x7a3   : > { %v1419_v36 = vsel %vm1072_vm5, %v3406_v35, 0.0 }
 0x7a4   : > { %1420 = vadd.xlane.f32.xlu1 %v1419_v36 }
 0x7b5   : > { %1503 = vrot.lane.b32.xlu1 %v4329_v29, %s3764_s13 }
 0x831   : > { %v1421_v38 = vpop.xlane.xlu1 %1420 }
 0x832   : > { %3407 = vrcp.f32 %v1421_v38 }
 0x835   : > { %v1504_v44 = vpop.permute.xlu1 %1503 }
 0x83c   : > { %v3408_v41 = vpop.eup %3407 }
 0x83d   : > { %v1423_v42 = vmul.f32 %v3408_v41, %v3406_v35 }
 0x83f   : > { %3014 = vmatmul.mubr.msk.f32.vlgmr.msra.gmra.mrb[8].mxu1 %vm1072_vm5, %v1423_v42 }
 0x840   : > { %3143 = vmatpush3.bf16.xpose.msk.msra.mxu1 %vm4314_vm4, %v3141_v43  ;;  %3020 = vmatprep.mubr.msk.f32.mxu1 %vm3760_vm2, %v3761_v12 }
 0x841   : > { %3151 = vmatprep.subr.bf16.mxu1 %v3759_v7 }
 0x847   : > { %3021 = vmatmul.mubr.msk.f32.vlgmr.msra.gmra.mrb[10].mxu1 %vm992_vm3, %v1504_v44 }
 0x848   : > { %3041 = vmatprep.mubr.msk.f32.mxu1 %vm3760_vm2, %v3761_v12 }
 0x912   : > { %v4402_v45 = vpop.f32.mrb[8].mxu1 }
 0x913   : > { %v3015_v46 = vpop.f32.mrb[9].mxu1 }
 0x91a   : > { %v1581_v47 = vpop.f32.mrb[10].mxu1 }
 0x91b   : > { %v3022_v48 = vpop.f32.mrb[11].mxu1  ;;  %v1585_v49 = vsel %vm1072_vm5, %v1581_v47, -inf }
 0x91c   : > { %1586 = vmax.xlane.f32.xlu0 %v1585_v49 }
 0x932   : > { %3353 = vrot.lane.b32.xlu0 %v4353_v50, %s3764_s13 }
 0x936   : > { %3358 = vrot.lane.b32.xlu0 %v4323_v27, %s3765_s20 }
 0x93a   : > { %1675 = vrot.lane.b32.xlu0 %v4329_v29, %s3765_s20 }
 0x9a9   : > { %v1587_v51 = vpop.xlane.xlu0 %1586 }
 0x9aa   : > { %v1588_v52 = vsub.f32 %v1581_v47, %v1587_v51 }
 0x9ac   : > { %v1589_v53 = vmul.f32 1.442695, %v1588_v52 }
 0x9ad   : > { %v3354_v54 = vpop.permute.xlu0 %3353 }
 0x9ae   : > { %3409 = vpow2.f32 %v1589_v53  ;;  %v3356_v55 = vunpack.i.h.bf16 %v3354_v54  ;;  %v3355_v56 = vunpack.i.l.bf16 %v3354_v54 }
 0x9b0   : > { %v3145_v57 = vpack.c.bf16 %v3356_v55, %v3355_v56 }
 0x9b1   : > { %v3359_v1 = vpop.permute.xlu0 %3358 }
 0x9b2   : > { %3146 = vmatpush3.bf16.msra.mxu0 %v3145_v57  ;;  %v3361_v3 = vunpack.i.h.bf16 %v3359_v1  ;;  %v3360_v4 = vunpack.i.l.bf16 %v3359_v1 }
 0x9b3   : > { %3147 = vmatprep.subr.bf16.mxu0 %v3759_v7 }
 0x9b4   : > { %v3148_v8 = vpack.c.bf16 %v3361_v3, %v3360_v4 }
 0x9b5   : > { %v1676_v9 = vpop.permute.xlu0 %1675 }
 0x9b8   : > { %v3410_v58 = vpop.eup %3409 }
 0x9b9   : > { %v1591_v60 = vsel %vm1072_vm5, %v3410_v58, 0.0 }
 0x9ba   : > { %1592 = vadd.xlane.f32.xlu1 %v1591_v60 }
 0x9cb   : > { %3363 = vrot.lane.b32.xlu1 %v4353_v50, %s3765_s20 }
 0x9cf   : > { %3368 = vrot.lane.b32.xlu1 %v4323_v27, %s3766_s7 }
 0xa47   : > { %v1593_v61 = vpop.xlane.xlu1 %1592 }
 0xa48   : > { %3411 = vrcp.f32 %v1593_v61 }
 0xa4b   : > { %v3364_v62 = vpop.permute.xlu1 %3363 }
 0xa4c   : > { %v3366_v63 = vunpack.i.h.bf16 %v3364_v62  ;;  %v3365_v0 = vunpack.i.l.bf16 %v3364_v62 }
 0xa4e   : > { %v3152_v2 = vpack.c.bf16 %v3366_v63, %v3365_v0 }
 0xa4f   : > { %v3369_v22 = vpop.permute.xlu1 %3368 }
 0xa50   : > { %3153 = vmatpush3.bf16.msra.mxu1 %v3152_v2  ;;  %v3371_v26 = vunpack.i.h.bf16 %v3369_v22  ;;  %v3370_v28 = vunpack.i.l.bf16 %v3369_v22 }
 0xa51   : > { %3154 = vmatprep.subr.bf16.mxu1 %v3759_v7 }
 0xa52   : > { %v3412_v5 = vpop.eup %3411  ;;  %v3155_v32 = vpack.c.bf16 %v3371_v26, %v3370_v28 }
 0xa53   : > { %v1595_v6 = vmul.f32 %v3412_v5, %v3410_v58 }
 0xa55   : > { %3028 = vmatmul.mubr.msk.f32.vlgmr.msra.gmra.mrb[8].mxu0 %vm1072_vm5, %v1595_v6 }
 0xa56   : > { %3150 = vmatpush3.bf16.xpose.msk.msra.mxu0 %vm4314_vm4, %v3148_v8  ;;  %3034 = vmatprep.mubr.msk.f32.mxu0 %vm3760_vm2, %v3761_v12 }
 0xa57   : > { %3158 = vmatprep.subr.bf16.mxu0 %v3759_v7 }
 0xa5d   : > { %3035 = vmatmul.mubr.msk.f32.vlgmr.msra.gmra.mrb[10].mxu0 %vm992_vm3, %v1676_v9 }
 0xa5e   : > { %3055 = vmatprep.mubr.msk.f32.mxu0 %vm3760_vm2, %v3761_v12 }
 0xb28   : > { %v4424_v10 = vpop.f32.mrb[8].mxu0 }
 0xb29   : > { %v3029_v11 = vpop.f32.mrb[9].mxu0 }
 0xb30   : > { %v1753_v13 = vpop.f32.mrb[10].mxu0 }
 0xb31   : > { %v3036_v14 = vpop.f32.mrb[11].mxu0  ;;  %v1757_v15 = vsel %vm1072_vm5, %v1753_v13, -inf }
 0xb32   : > { %1758 = vmax.xlane.f32.xlu0 %v1757_v15 }
 0xbbf   : > { %v1759_v16 = vpop.xlane.xlu0 %1758 }
 0xbc0   : > { %v1760_v18 = vsub.f32 %v1753_v13, %v1759_v16 }
 0xbc2   : > { %v1761_v19 = vmul.f32 1.442695, %v1760_v18 }
 0xbc4   : > { %3413 = vpow2.f32 %v1761_v19 }
 0xbce   : > { %v3414_v20 = vpop.eup %3413 }
 0xbcf   : > { %v1763_v21 = vsel %vm1072_vm5, %v3414_v20, 0.0 }
 0xbd0   : > { %1764 = vadd.xlane.f32.xlu1 %v1763_v21 }
 0xbe1   : > { %1847 = vrot.lane.b32.xlu1 %v4329_v29, %s3766_s7 }
 0xc5d   : > { %v1765_v23 = vpop.xlane.xlu1 %1764 }
 0xc5e   : > { %3415 = vrcp.f32 %v1765_v23 }
 0xc61   : > { %v1848_v33 = vpop.permute.xlu1 %1847 }
 0xc68   : > { %v3416_v30 = vpop.eup %3415 }
 0xc69   : > { %v1767_v31 = vmul.f32 %v3416_v30, %v3414_v20 }
 0xc6b   : > { %3042 = vmatmul.mubr.msk.f32.vlgmr.msra.gmra.mrb[12].mxu1 %vm1072_vm5, %v1767_v31 }
 0xc6c   : > { %3157 = vmatpush3.bf16.xpose.msk.msra.mxu1 %vm4314_vm4, %v3155_v32  ;;  %3048 = vmatprep.mubr.msk.f32.mxu1 %vm3760_vm2, %v3761_v12 }
 0xc6d   : > { %3165 = vmatprep.subr.bf16.mxu1 %v3759_v7 }
 0xc73   : > { %3049 = vmatmul.mubr.msk.f32.vlgmr.msra.gmra.mrb[14].mxu1 %vm992_vm3, %v1848_v33 }
 0xc74   : > { %3069 = vmatprep.mubr.msk.f32.mxu1 %vm3760_vm2, %v3761_v12 }
 0xd3e   : > { %v4439_v34 = vpop.f32.mrb[12].mxu1 }
 0xd3f   : > { %v3043_v35 = vpop.f32.mrb[13].mxu1 }
 0xd46   : > { %v1925_v36 = vpop.f32.mrb[14].mxu1 }
 0xd47   : > { %v3050_v37 = vpop.f32.mrb[15].mxu1  ;;  %v1929_v38 = vsel %vm1072_vm5, %v1925_v36, -inf }
 0xd48   : > { %1930 = vmax.xlane.f32.xlu0 %v1929_v38  ;;  %v2404_v37 = vld [vmem:[%s4247_s1 + $0x8] sm:$0xff]  ;;  %v2405_v38 = vld [vmem:[%s4247_s1 + $0x10] sm:$0xff] }
 0xd5e   : > { %3373 = vrot.lane.b32.xlu0 %v4353_v50, %s3766_s7 }
 0xd62   : > { %3378 = vrot.lane.b32.xlu0 %v4323_v27, %s3767_s28 }
 0xd66   : > { %2019 = vrot.lane.b32.xlu0 %v4329_v29, %s3767_s28 }
 0xdd5   : > { %v1931_v39 = vpop.xlane.xlu0 %1930 }
 0xdd6   : > { %v1932_v40 = vsub.f32 %v1925_v36, %v1931_v39  ;;  %v2403_v36 = vld [vmem:[%s4247_s1] sm:$0xff] }
 0xdd7   : > { %v3176_v39 = vpack.c.bf16 %v2404_v37, %v2403_v36 }
 0xdd8   : > { %v1933_v41 = vmul.f32 1.442695, %v1932_v40  ;;  %v2406_v40 = vld [vmem:[%s4247_s1 + $0x18] sm:$0xff] }
 0xdd9   : > { %v3374_v42 = vpop.permute.xlu0 %3373 }
 0xdda   : > { %3417 = vpow2.f32 %v1933_v41  ;;  %v3376_v43 = vunpack.i.h.bf16 %v3374_v42  ;;  %v3375_v44 = vunpack.i.l.bf16 %v3374_v42  ;;  %v3179_v41 = vpack.c.bf16 %v2406_v40, %v2405_v38 }
 0xddc   : > { %v3159_v46 = vpack.c.bf16 %v3376_v43, %v3375_v44 }
 0xddd   : > { %v3379_v54 = vpop.permute.xlu0 %3378 }
 0xdde   : > { %3160 = vmatpush3.bf16.msra.mxu0 %v3159_v46  ;;  %v3381_v56 = vunpack.i.h.bf16 %v3379_v54  ;;  %v3380_v57 = vunpack.i.l.bf16 %v3379_v54 }
 0xddf   : > { %3161 = vmatprep.subr.bf16.mxu0 %v3759_v7 }
 0xde0   : > { %v3162_v61 = vpack.c.bf16 %v3381_v56, %v3380_v57 }
 0xde4   : > { %v3418_v47 = vpop.eup %3417 }
 0xde5   : > { %v1935_v48 = vsel %vm1072_vm5, %v3418_v47, 0.0 }
 0xde6   : > { %1936 = vadd.xlane.f32.xlu1 %v1935_v48 }
 0xdf7   : > { %3383 = vrot.lane.b32.xlu1 %v4353_v50, %s3767_s28 }
 0xdfb   : > { %3388 = vrot.lane.b32.xlu1 %v4323_v27, %s3768_s17  ;;  %v2020_v27 = vpop.permute.xlu0 %2019 }
 0xe73   : > { %v1937_v49 = vpop.xlane.xlu1 %1936 }
 0xe74   : > { %3419 = vrcp.f32 %v1937_v49 }
 0xe77   : > { %v3384_v51 = vpop.permute.xlu1 %3383 }
 0xe78   : > { %v3386_v52 = vunpack.i.h.bf16 %v3384_v51  ;;  %v3385_v53 = vunpack.i.l.bf16 %v3384_v51 }
 0xe7a   : > { %v3166_v55 = vpack.c.bf16 %v3386_v52, %v3385_v53 }
 0xe7b   : > { %v3389_v9 = vpop.permute.xlu1 %3388 }
 0xe7c   : > { %3167 = vmatpush3.bf16.msra.mxu1 %v3166_v55  ;;  %v3391_v13 = vunpack.i.h.bf16 %v3389_v9  ;;  %v3390_v14 = vunpack.i.l.bf16 %v3389_v9  ;;  %v2860_v9 = vld [vmem:[%s718_s19] ss:$0 sm:$0xff] (!%p2858_p11) }
 0xe7d   : > { %3168 = vmatprep.subr.bf16.mxu1 %v3759_v7 }
 0xe7e   : > { %v3420_v58 = vpop.eup %3419  ;;  %v3169_v18 = vpack.c.bf16 %v3391_v13, %v3390_v14 }
 0xe7f   : > { %v1939_v60 = vmul.f32 %v3420_v58, %v3418_v47 }
 0xe81   : > { %3056 = vmatmul.mubr.msk.f32.vlgmr.msra.gmra.mrb[12].mxu0 %vm1072_vm5, %v1939_v60 }
 0xe82   : > { %3164 = vmatpush3.bf16.xpose.msk.msra.mxu0 %vm4314_vm4, %v3162_v61  ;;  %3062 = vmatprep.mubr.msk.f32.mxu0 %vm3760_vm2, %v3761_v12 }
 0xe83   : > { %3172 = vmatprep.subr.bf16.mxu0 %v3759_v7 }
 0xe89   : > { %3063 = vmatmul.mubr.msk.f32.vlgmr.msra.gmra.mrb[14].mxu0 %vm992_vm3, %v2020_v27 }
 0xe8a   : > { %3083 = vmatprep.mubr.msk.f32.mxu0 %vm3760_vm2, %v3761_v12 }
 0xf54   : > { %v2015_v62 = vpop.f32.mrb[12].mxu0 }
 0xf55   : > { %v3057_v63 = vpop.f32.mrb[13].mxu0 }
 0xf5c   : > { %v2097_v0 = vpop.f32.mrb[14].mxu0 }
 0xf5d   : > { %v3064_v1 = vpop.f32.mrb[15].mxu0  ;;  %v2101_v2 = vsel %vm1072_vm5, %v2097_v0, -inf }
 0xf5e   : > { %2102 = vmax.xlane.f32.xlu0 %v2101_v2 }
 0xfeb   : > { %v2103_v3 = vpop.xlane.xlu0 %2102 }
 0xfec   : > { %v2104_v4 = vsub.f32 %v2097_v0, %v2103_v3 }
 0xfee   : > { %v2105_v5 = vmul.f32 1.442695, %v2104_v4 }
 0xff0   : > { %3421 = vpow2.f32 %v2105_v5 }
 0xffa   : > { %v3422_v6 = vpop.eup %3421 }
 0xffb   : > { %v2107_v8 = vsel %vm1072_vm5, %v3422_v6, 0.0 }
 0xffc   : > { %2108 = vadd.xlane.f32.xlu1 %v2107_v8 }
0x100d   : > { %2191 = vrot.lane.b32.xlu1 %v4329_v29, %s3768_s17 }
0x1089   : > { %v2109_v11 = vpop.xlane.xlu1 %2108 }
0x108a   : > { %3423 = vrcp.f32 %v2109_v11 }
0x108d   : > { %v2192_v19 = vpop.permute.xlu1 %2191 }
0x1094   : > { %v3424_v15 = vpop.eup %3423 }
0x1095   : > { %v2111_v16 = vmul.f32 %v3424_v15, %v3422_v6  ;;  %v2859_v6 = vld [vmem:[%s715_s4] ss:$0 sm:$0xff] (!%p2858_p11) }
0x1097   : > { %3070 = vmatmul.mubr.msk.f32.vlgmr.msra.gmra.mrb[16].mxu1 %vm1072_vm5, %v2111_v16 }
0x1098   : > { %3171 = vmatpush3.bf16.xpose.msk.msra.mxu1 %vm4314_vm4, %v3169_v18  ;;  %3076 = vmatprep.mubr.msk.f32.mxu1 %vm3760_vm2, %v3761_v12 }
0x109f   : > { %3077 = vmatmul.mubr.msk.f32.vlgmr.msra.gmra.mrb[18].mxu1 %vm992_vm3, %v2192_v19 }
0x116a   : > { %v2187_v29 = vpop.f32.mrb[16].mxu1 }
0x116b   : > { %v3071_v20 = vpop.f32.mrb[17].mxu1 }
0x1172   : > { %v2269_v21 = vpop.f32.mrb[18].mxu1 }
0x1173   : > { %v3078_v22 = vpop.f32.mrb[19].mxu1  ;;  %v2273_v23 = vsel %vm1072_vm5, %v2269_v21, -inf }
0x1174   : > { %2274 = vmax.xlane.f32.xlu0 %v2273_v23 }
0x118a   : > { %3393 = vrot.lane.b32.xlu0 %v4353_v50, %s3768_s17 }
0x118e   : > { %2364 = vrot.lane.b32.xlu0 %v4387_v24, %s3769_s9 }
0x1192   : > { %2368 = vrot.lane.b32.xlu0 %v4402_v45, %s3770_s6 }
0x1196   : > { %2372 = vrot.lane.b32.xlu0 %v4424_v10, %s3771_s11 }
0x119a   : > { %2380 = vrot.lane.b32.xlu0 %v2015_v62, %s3772_s14 }
0x119e   : > { %2384 = vrot.lane.b32.xlu0 %v2187_v29, %s3773_s24 }
0x1201   : > { %v2275_v25 = vpop.xlane.xlu0 %2274 }
0x1202   : > { %v2276_v26 = vsub.f32 %v2269_v21, %v2275_v25 }
0x1204   : > { %v2277_v28 = vmul.f32 1.442695, %v2276_v26 }
0x1205   : > { %v3394_v30 = vpop.permute.xlu0 %3393 }
0x1206   : > { %3425 = vpow2.f32 %v2277_v28  ;;  %v3396_v31 = vunpack.i.h.bf16 %v3394_v30  ;;  %v3395_v50 = vunpack.i.l.bf16 %v3394_v30 }
0x1208   : > { %v3173_v24 = vpack.c.bf16 %v3396_v31, %v3395_v50 }
0x1209   : > { %v2365_v43 = vpop.permute.xlu0 %2364 }
0x120a   : > { %3174 = vmatpush3.bf16.msra.mxu0 %v3173_v24  ;;  %v2391_v47 = vsel %vm992_vm3, %v4365_v59, %v2365_v43  ;;  %v2856_v59 = vld [vmem:[%s712_s0] ss:$0 sm:$0xff] }
0x120b   : > { %3175 = vmatprep.subr.bf16.mxu0 %v3759_v7 }
0x120d   : > { %v2369_v44 = vpop.permute.xlu0 %2368 }
0x120e   : > { %v2393_v49 = vsel %vm2392_vm6, %v2391_v47, %v2369_v44 }
0x1210   : > { %v3426_v45 = vpop.eup %3425 }
0x1211   : > { %v2279_v10 = vsel %vm1072_vm5, %v3426_v45, 0.0  ;;  %v2373_v46 = vpop.permute.xlu0 %2372 }
0x1212   : > { %2280 = vadd.xlane.f32.xlu1 %v2279_v10  ;;  %v2395_v51 = vsel %vm2394_vm7, %v2393_v49, %v2373_v46 }
0x1223   : > { %2376 = vrot.lane.b32.xlu1 %v4439_v34, %s3774_s21 }
0x129f   : > { %v2281_v32 = vpop.xlane.xlu1 %2280 }
0x12a0   : > { %3427 = vrcp.f32 %v2281_v32 }
0x12a3   : > { %v2377_v48 = vpop.permute.xlu1 %2376 }
0x12aa   : > { %v3428_v33 = vpop.eup %3427 }
0x12ab   : > { %v2283_v35 = vmul.f32 %v3428_v33, %v3426_v45 }
0x12ad   : > { %3084 = vmatmul.mubr.msk.f32.vlgmr.msra.gmra.mrb[16].mxu0 %vm1072_vm5, %v2283_v35 }
0x12ae   : > { %3094 = vmatprep.mubr.msk.f32.mxu0 %vm3760_vm2, %v3761_v12  ;;  %3177 = vmatpush3.bf16.msra.mxu0 %v3176_v39  ;;  %v2381_v12 = vpop.permute.xlu0 %2380 }
0x12af   : > { %3178 = vmatprep.subr.bf16.mxu0 %v3759_v7  ;;  %v2396_v7 = vsel %vm1072_vm5, %v2395_v51, %v2377_v48 }
0x12b0   : > { %v2398_v53 = vsel %vm2397_vm8, %v2396_v7, %v2381_v12 }
0x12b2   : > { %3180 = vmatpush3.bf16.msra.mxu0 %v3179_v41  ;;  %v2385_v52 = vpop.permute.xlu0 %2384 }
0x12b3   : > { %v2400_v54 = vsel %vm2399_vm9, %v2398_v53, %v2385_v52 }
0x1380   : > { %v2359_v34 = vpop.f32.mrb[16].mxu0 }
0x1381   : > { %2388 = vrot.lane.b32.xlu0 %v2359_v34, %s3775_s22  ;;  %v3085_v42 = vpop.f32.mrb[17].mxu0 }
0x13f3   : > { %v2389_v55 = vpop.permute.xlu0 %2388 }
0x13f4   : > { %v2402_v56 = vsel %vm2401_vm10, %v2400_v54, %v2389_v55 }
0x13f5   : > { %3095 = vmatmul.mubr.msk.f32.vlgmr.msra.gmra.mrb[18].mxu0 %vm740_vm1, %v2402_v56 }
0x14c5   : > { %2491 = sbr.rel (%p2858_p11) target bundleno = 5639 (0x1607), region = 100 }
0x14c8   : > { %v2483_v57 = vpop.f32.mrb[18].mxu0 }
0x14c9   : > { %v2484_v58 = vadd.f32 %v2856_v59, %v2483_v57  ;;  %v3096_v60 = vpop.f32.mrb[19].mxu0 }
0x14cb   : > { %v2487_v61 = vadd.f32 %v2484_v58, %v4298_v17 }
0x14cd   : > { %v2492_v27 = vsel %vm740_vm1, %v2487_v61, 0.0 }
0x14ce   : > { %2493 = vadd.xlane.f32.xlu0 %v2492_v27 }
0x155b   : > { %v2494_v62 = vpop.xlane.xlu0 %2493 }
0x155c   : > { %v2496_v63 = vmul.f32 0.03125, %v2494_v62 }
0x155e   : > { %v2497_v0 = vsub.f32 %v2487_v61, %v2496_v63 }
0x1560   : > { %v2498_v1 = vmul.f32 %v2497_v0, %v2497_v0 }
0x1562   : > { %v2499_v2 = vsel %vm740_vm1, %v2498_v1, 0.0 }
0x1563   : > { %2500 = vadd.xlane.f32.xlu0 %v2499_v2 }
0x15f0   : > { %v2501_v3 = vpop.xlane.xlu0 %2500 }
0x15f1   : > { %v2502_v4 = vmul.f32 0.03125, %v2501_v3 }
0x15f3   : > { %v2503_v5 = vadd.f32 1e-05, %v2502_v4 }
0x15f5   : > { %3429 = vrsqrt.f32 %v2503_v5 }
0x15ff   : > { %v3430_v17 = vpop.eup %3429 }
0x1600   : > { %v2505_v8 = vmul.f32 %v3430_v17, %v2497_v0 }
0x1602   : > { %v2513_v11 = vmul.f32 %v2859_v6, %v2505_v8 }
0x1604   : > { %v2521_v13 = vadd.f32 %v2860_v9, %v2513_v11 }
0x1606   : > { %2522 = vst.msk [vmem:[#allocation2] sm:$0xff] %vm740_vm1, %v2521_v13 }
0x1607 PF: > { %s4710_s29 = sld [smem:[#allocation26_spill]] }
0x160d   : > { %p2861_p4 = scmp.ne.s32.totalorder %s4710_s29, 2 }
0x160e   : > { %2527 = vst.msk [vmem:[%s4283_s23] sm:$0xff] (!%p2861_p4), %vm740_vm1, %v2487_v61 }
0x160f   : > { %2526 = sbr.rel (%p2861_p4) target bundleno = 5654 (0x1616), region = 104 }
0x1616 PF: > { %s4711_s18 = sld [smem:[#allocation27_spill]]  ;;  %s4712_s4 = sld [smem:[#allocation31_spill]] }
0x1617   : > { %s4713_s19 = sld [smem:[#allocation50_spill]]  ;;  %s2542_s20 = sshll.u32 %s4283_s23, 4  ;;  %s2543_s20 = int_to_ptr.vmem [resolvable:$true] %s2542_s20 }
0x1618   : > { %s2529_s7 = scalar_lea.sflag [#allocation5], %s4214_s10  ;;  %s3611_s28 = scalar_lea.vmem %s2543_s20, 128 }
0x1619   : > { %p3612_p2 = scmp.ne.s32.totalorder %s2543_s20, %s3611_s28  ;;  %s3776_s17 = smov [#allocation14]  }
0x161a   : > { %s3615_s9 = sshll.u32 %s3776_s17, 4  ;;  %s3616_s9 = int_to_ptr.vmem [resolvable:$false] %s3615_s9 }
0x161b   : > { %s3617_s6 = scalar_lea.vmem %s3616_s9, 256  ;;  %p3618_p0 = scmp.lt.s32.totalorder %s2543_s20, %s3616_s9 }
0x161c   : > { %s2863_s15 = sshll.u32 %s4711_s18, 7  ;;  %p4714_p3 = scmp.ne.s32.totalorder %s4712_s4, 0 }
0x161d   : > { %s4519_s13 = scalar_lea.hbm %s4713_s19, %s2863_s15  ;;  %p3619_p5 = scmp.lt.s32.totalorder %s3617_s6, %s3611_s28 }
0x161e   : > { %p3613_p6 = pnand %p3612_p2, %p4714_p3 }
0x161f   : > { %p3620_p8 = por %p3619_p5, %p3618_p0 }
0x1620   : > { %p3614_p7 = pneg %p3613_p6 }
0x1622   : > { %p3621_p13 = pnand %p3620_p8, %p3614_p7 }
0x1624   : > { %3624 = shalt.err (!%p3621_p13)
}
0x1625   : > { %s3625_s23 = scalar_lea.hbm %s4519_s13, 128  ;;  %s3629_s14 = scalar_lea.hbm %s4713_s19, 256 }
0x1626   : > { %p3626_p9 = scmp.ne.s32.totalorder %s4519_s13, %s3625_s23  ;;  %p3630_p1 = scmp.lt.u32.totalorder %s4519_s13, %s4713_s19 }
0x1627   : > { %p3631_p11 = scmp.lt.u32.totalorder %s3629_s14, %s3625_s23  ;;  %p3633_p2 = scmp.lt.u32.totalorder %s3625_s23, %s4519_s13 }
0x1628   : > { %p3627_p10 = pnand %p3626_p9, %p4714_p3 }
0x1629   : > { %p3632_p4 = por %p3631_p11, %p3630_p1 }
0x162a   : > { %p3628_p12 = pneg %p3627_p10 }
0x162b   : > { %p3634_p6 = por %p3633_p2, %p3632_p4 }
0x162d   : > { %p3635_p7 = pnand %p3634_p6, %p3628_p12 }
0x162f   : > { %3638 = shalt.err (!%p3635_p7)
}
0x1630   : > { %3193 = dma.vmem_to_hbm [thread:$0]  (%p4714_p3), %s2543_s20, 128, %s4519_s13, %s2529_s7  }
0x1631 PF: > { %s4715_s22 = sld [smem:[#allocation30_spill]]  ;;  %s4716_s1 = sld [smem:[#allocation23_spill]] }
0x1632   : > { %s4717_s2 = sld [smem:[#allocation32_spill]] }
0x1637   : > { %p3219_p0 = scmp.ge.s32.totalorder %s4715_s22, 2  ;;  %s2554_s8 = sand.u32 1, %s4716_s1  }
0x1638   : > { %p4718_p5 = scmp.ne.s32.totalorder %s4717_s2, 0  ;;  %s2555_s25 = scalar_lea.sflag [#allocation5], %s2554_s8 }
0x163a   : > { %p3215_p8 = pnand %p3219_p0, %p4718_p5 }
0x163c   : > { %3704 = dma.done.wait (!%p3215_p8), %s2555_s25, 128  }
0x163d   : > { %3706 = vsyncadd (!%p3215_p8), %s2555_s25, 4294967168  ;;  %s37_s13 = sadd.s32 1, %s4715_s22   ;;  %s4719_s21 = sld [smem:[#allocation21_spill]] }
0x163e   : > { %p34_p13 = scmp.ge.s32.totalorder %s37_s13, 8   ;;  %s4720_s22 = sld [smem:[#allocation22_spill]] }
0x163f   : > { %s4721_s23 = sld [smem:[#allocation36_spill]]  ;;  %s4722_s24 = sld [smem:[#allocation24_spill]] }
0x1640   : > { %s4723_s25 = sld [smem:[#allocation25_spill]]  ;;  %s4724_s26 = sld [smem:[#allocation37_spill]] }
0x1641   : > { %s4725_s27 = sld [smem:[#allocation28_spill]]  ;;  %s4726_s28 = sld [smem:[#allocation29_spill]] }
0x1642   : > { %s4727_s29 = sld [smem:[#allocation33_spill]]  ;;  %s4728_s30 = sld [smem:[#allocation35_spill]] }
0x1643   :  { %36 = sbr.rel (!%p34_p13) target bundleno = 29 (0x1d), region = 204 }
0x164a   :  { %2560 = vsyncpa [#allocation4], 1 }
0x164b   :  { %2562 = vsyncpa [#allocation4 + $0x1], 1 }
0x164c   :  { %2563 = vsyncpa [#allocation7], 1 }
0x164d   :  { %2565 = vsyncpa [#allocation7 + $0x1], 1 }
0x164e   :  { %2566 = vsyncpa [#allocation10], 1 }
0x164f   :  { %2568 = vsyncpa [#allocation10 + $0x1], 1 }
0x1650   :  { %2569 = vsyncpa [#allocation13], 1 }
0x1651   :  { %2571 = vsyncpa [#allocation13 + $0x1], 1 }
0x1652   :  { %2572 = vsyncpa [#allocation5], 1 }
0x1653   :  { %2574 = vsyncpa [#allocation5 + $0x1], 1 }

</bundles_post_ra>
